<compile_context>
chip_gen: v6e
topology: v6e:2x2x1
jax: 0.10.0
libtpu: 0.0.40
codegen_flags: <defaults>
</compile_context>

<pallas_src>
import jax
import jax.numpy as jnp
from jax.experimental import pallas as pl
from jax.experimental.pallas import tpu as pltpu


def _round_up(n, m):
    return ((n + m - 1) // m) * m


def _fcnet_kernel(x_ref,
                  w0_ref, b0_ref,
                  w1_ref, b1_ref,
                  w2_ref, b2_ref,
                  w3_ref, b3_ref,
                  w4_ref, b4_ref,
                  out_ref):
    """Whole MLP for one batch tile: 5 bf16 matmuls (f32 accum), ReLU on 0-3."""

    def layer(h, w_ref, b_ref, relu):
        # bf16 operands into the MXU (no-op cast for the bf16 input tile),
        # f32 accumulation, f32 bias/ReLU epilogue on the VPU.
        acc = jnp.dot(h.astype(jnp.bfloat16), w_ref[...],
                      preferred_element_type=jnp.float32)
        acc = acc + b_ref[...]
        if relu:
            acc = jnp.maximum(acc, 0.0)
        return acc

    h = x_ref[...]                         # (bt, in_dim) bf16
    h = layer(h, w0_ref, b0_ref, True)     # input_transform + ReLU
    h = layer(h, w1_ref, b1_ref, True)     # d1 + ReLU
    h = layer(h, w2_ref, b2_ref, True)     # d2 + ReLU
    h = layer(h, w3_ref, b3_ref, True)     # d3 + ReLU
    h = layer(h, w4_ref, b4_ref, False)    # d4 (no activation, matches forward)
    out_ref[...] = h.astype(out_ref.dtype)


def prepare_fcnet_params(params):
    """One-time parameter prep (hoisted out of the forward path).

    params : list of (W, b); W: (in, out) f32, b: (1, out) f32
             (nn.Linear semantics y = x @ W + b, W already transposed).

    Returns a dict with:
      layers  : list of (W_pad bf16, b_pad f32) with all hidden/output dims
                zero-padded to multiples of 128 (input dim left unpadded).
      out_dim : real (unpadded) output dim.
    Zero padding is numerically exact through matmul + bias + ReLU.
    """
    assert len(params) == 5, "FCnet has exactly 5 Linear layers"
    layers = []
    prev_real = params[0][0].shape[0]   # input feature dim (e.g. 784), unpadded
    prev_pad = prev_real
    for (w, b) in params:
        k_in, k_out = w.shape
        assert k_in == prev_real, "layer dims must chain"
        k_out_p = _round_up(k_out, 128)
        wp = jnp.zeros((prev_pad, k_out_p), jnp.bfloat16)
        wp = wp.at[:k_in, :k_out].set(w.astype(jnp.bfloat16))
        bp = jnp.zeros((1, k_out_p), jnp.float32)
        bp = bp.at[:, :k_out].set(b.astype(jnp.float32))
        layers.append((wp, bp))
        prev_real, prev_pad = k_out, k_out_p
    return {"layers": layers, "out_dim": params[-1][0].shape[1]}


def fcnet_forward(x_nchw, prepared, *, single_buffer_weights=True):
    """FCnet forward.

    x_nchw   : (B, C, H, W) float32
    prepared : output of prepare_fcnet_params (padded bf16 weights, f32 biases)
    Returns (B, 100) float32.
    """
    layers = prepared["layers"]
    out_dim = prepared["out_dim"]
    in_dim = layers[0][0].shape[0]
    out_dim_p = layers[-1][0].shape[1]

    B = x_nchw.shape[0]
    x = x_nchw.reshape(B, -1)                      # flatten(start_dim=1)
    assert x.shape[1] == in_dim, (x.shape, in_dim)
    x = x.astype(jnp.bfloat16)                     # halve the per-row HBM stream

    # --- batch tiling -------------------------------------------------------
    if B <= 128:
        bt = _round_up(B, 8)                       # one grid step, no overhead
    else:
        # 128-row granularity (MXU/lane friendly), cap at 512 rows, and keep
        # >= 2 grid steps so v7x megacore can shard the batch axis.
        bt = min(512, _round_up(-(-B // 2), 128))
    B_pad = _round_up(B, bt)
    if B_pad != B:
        x = jnp.pad(x, ((0, B_pad - B), (0, 0)))

    grid = (B_pad // bt,)
    # x / out blocks: last dim is either the full array dim (in_dim) or a
    # 128-multiple (out_dim_p) -> legal and lane-dense output stores.
    x_spec = pl.BlockSpec((bt, in_dim), lambda i: (i, 0))
    out_spec = pl.BlockSpec((bt, out_dim_p), lambda i: (i, 0))

    flat_params = []
    for (wp, bp) in layers:
        flat_params.extend([wp, bp])

    def _call(single_buffer):
        # Weights/biases: full-array blocks with constant index_map -> resident
        # in VMEM across grid steps; single-buffered when supported (their
        # block never changes, so double buffering only wastes VMEM).
        pm = {"pipeline_mode": pl.Buffered(1)} if single_buffer else {}
        param_specs = []
        for (wp, bp) in layers:
            param_specs.append(pl.BlockSpec(wp.shape, lambda i: (0, 0), **pm))
            param_specs.append(pl.BlockSpec(bp.shape, lambda i: (0, 0), **pm))
        return pl.pallas_call(
            _fcnet_kernel,
            out_shape=jax.ShapeDtypeStruct((B_pad, out_dim_p), jnp.float32),
            grid=grid,
            in_specs=[x_spec] + param_specs,
            out_specs=out_spec,
            compiler_params=pltpu.CompilerParams(
                dimension_semantics=("parallel",),
            ),
        )(x, *flat_params)

    if single_buffer_weights:
        try:
            out_p = _call(True)
        except Exception:
            # pipeline_mode=Buffered(1) not supported on this JAX version;
            # fall back to default (double-buffered) weight blocks.
            out_p = _call(False)
    else:
        out_p = _call(False)

    return out_p[:B, :out_dim]


def init_fcnet_params(key, starting_size, image_size=28, channels=1):
    """Deterministic init mirroring nn.Linear shapes (uniform +-1/sqrt(fan_in))."""
    dims = [
        image_size * image_size * channels,
        starting_size,
        starting_size // 2,
        starting_size // 4,
        starting_size // 8,
        100,
    ]
    params = []
    for i in range(len(dims) - 1):
        fan_in, fan_out = dims[i], dims[i + 1]
        key, kw, kb = jax.random.split(key, 3)
        bound = 1.0 / jnp.sqrt(jnp.float32(fan_in))
        w = jax.random.uniform(kw, (fan_in, fan_out), jnp.float32, -bound, bound)
        b = jax.random.uniform(kb, (1, fan_out), jnp.float32, -bound, bound)
        params.append((w, b))
    return params


def fcnet_reference(x_nchw, params):
    """Pure-JAX reference using the same numerics as the kernel
    (bf16 matmul operands, f32 accumulation, f32 bias/ReLU)."""
    h = x_nchw.reshape(x_nchw.shape[0], -1).astype(jnp.float32)
    for i, (w, b) in enumerate(params):
        h = jnp.dot(h.astype(jnp.bfloat16), w.astype(jnp.bfloat16),
                    preferred_element_type=jnp.float32) + b
        if i < len(params) - 1:
            h = jnp.maximum(h, 0.0)
    return h


if __name__ == "__main__":
    key = jax.random.PRNGKey(0)
    key, kx = jax.random.split(key)

    # MNIST-like shapes consistent with the module: 1-channel 28x28 images.
    batch, channels, image_size = 4, 1, 28
    starting_size = 64   # hidden dims: 64 -> 32 -> 16 -> 8 -> 100

    x = jax.random.normal(kx, (batch, channels, image_size, image_size),
                          dtype=jnp.float32)
    raw_params = init_fcnet_params(key, starting_size, image_size, channels)

    # One-time parameter prep (padding + bf16 cast hoisted out of the forward).
    prepared = prepare_fcnet_params(raw_params)

    out = fcnet_forward(x, prepared)
    out = jax.block_until_ready(out)

    ref = fcnet_reference(x, raw_params)
    assert out.shape == (batch, 100), out.shape
    assert jnp.allclose(out, ref, atol=2e-3, rtol=2e-3), "mismatch vs reference"

    print("KERNEL_OK")
</pallas_src>

<mosaic_0001>
module attributes {stable_mosaic.version = 11 : i64} {
  func.func @_fcnet_kernel(%arg0: i32, %arg1: memref<8x784xbf16, #tpu.memory_space<vmem>>, %arg2: memref<784x128xbf16, #tpu.memory_space<vmem>>, %arg3: memref<1x128xf32, #tpu.memory_space<vmem>>, %arg4: memref<128x128xbf16, #tpu.memory_space<vmem>>, %arg5: memref<1x128xf32, #tpu.memory_space<vmem>>, %arg6: memref<128x128xbf16, #tpu.memory_space<vmem>>, %arg7: memref<1x128xf32, #tpu.memory_space<vmem>>, %arg8: memref<128x128xbf16, #tpu.memory_space<vmem>>, %arg9: memref<1x128xf32, #tpu.memory_space<vmem>>, %arg10: memref<128x128xbf16, #tpu.memory_space<vmem>>, %arg11: memref<1x128xf32, #tpu.memory_space<vmem>>, %arg12: memref<8x128xf32, #tpu.memory_space<vmem>>) attributes {dimension_semantics = [#tpu.dimension_semantics<parallel>], iteration_bounds = array<i64: 1>, scalar_prefetch = 0 : i64, scratch_operands = 0 : i64, tpu.core_type = #tpu.core_type<tc>, window_params = [{transform_indices = @transform_0, window_bounds = array<i64: 8, 784>}, {pipeline_mode = #tpu.pipeline_mode<synchronous>, transform_indices = @transform_1, window_bounds = array<i64: 784, 128>}, {pipeline_mode = #tpu.pipeline_mode<synchronous>, transform_indices = @transform_2, window_bounds = array<i64: 1, 128>}, {pipeline_mode = #tpu.pipeline_mode<synchronous>, transform_indices = @transform_3, window_bounds = array<i64: 128, 128>}, {pipeline_mode = #tpu.pipeline_mode<synchronous>, transform_indices = @transform_4, window_bounds = array<i64: 1, 128>}, {pipeline_mode = #tpu.pipeline_mode<synchronous>, transform_indices = @transform_5, window_bounds = array<i64: 128, 128>}, {pipeline_mode = #tpu.pipeline_mode<synchronous>, transform_indices = @transform_6, window_bounds = array<i64: 1, 128>}, {pipeline_mode = #tpu.pipeline_mode<synchronous>, transform_indices = @transform_7, window_bounds = array<i64: 128, 128>}, {pipeline_mode = #tpu.pipeline_mode<synchronous>, transform_indices = @transform_8, window_bounds = array<i64: 1, 128>}, {pipeline_mode = #tpu.pipeline_mode<synchronous>, transform_indices = @transform_9, window_bounds = array<i64: 128, 128>}, {pipeline_mode = #tpu.pipeline_mode<synchronous>, transform_indices = @transform_10, window_bounds = array<i64: 1, 128>}, {transform_indices = @transform_11, window_bounds = array<i64: 8, 128>}]} {
    %c0 = arith.constant 0 : index
    %c0_0 = arith.constant 0 : index
    %0 = vector.load %arg1[%c0, %c0_0] : memref<8x784xbf16, #tpu.memory_space<vmem>>, vector<8x784xbf16>
    %c0_1 = arith.constant 0 : index
    %c0_2 = arith.constant 0 : index
    %1 = vector.load %arg2[%c0_1, %c0_2] : memref<784x128xbf16, #tpu.memory_space<vmem>>, vector<784x128xbf16>
    %cst = arith.constant dense<0.000000e+00> : vector<8x128xf32>
    %2 = tpu.matmul %0, %1, %cst {dimension_numbers = #tpu.dot_dimension_numbers<[1], [0], [0], [1], [0, 0, 1, 1], [], []>} : vector<8x784xbf16>, vector<784x128xbf16>, vector<8x128xf32> -> vector<8x128xf32>
    %c0_3 = arith.constant 0 : index
    %c0_4 = arith.constant 0 : index
    %3 = vector.load %arg3[%c0_3, %c0_4] : memref<1x128xf32, #tpu.memory_space<vmem>>, vector<1x128xf32>
    %4 = vector.broadcast %3 : vector<1x128xf32> to vector<8x128xf32>
    %5 = arith.addf %2, %4 : vector<8x128xf32>
    %cst_5 = arith.constant 0.000000e+00 : f32
    %6 = vector.broadcast %cst_5 : f32 to vector<8x128xf32>
    %7 = arith.maximumf %5, %6 : vector<8x128xf32>
    %8 = arith.truncf %7 : vector<8x128xf32> to vector<8x128xbf16>
    %c0_6 = arith.constant 0 : index
    %c0_7 = arith.constant 0 : index
    %9 = vector.load %arg4[%c0_6, %c0_7] : memref<128x128xbf16, #tpu.memory_space<vmem>>, vector<128x128xbf16>
    %cst_8 = arith.constant dense<0.000000e+00> : vector<8x128xf32>
    %10 = tpu.matmul %8, %9, %cst_8 {dimension_numbers = #tpu.dot_dimension_numbers<[1], [0], [0], [1], [0, 0, 1, 1], [], []>} : vector<8x128xbf16>, vector<128x128xbf16>, vector<8x128xf32> -> vector<8x128xf32>
    %c0_9 = arith.constant 0 : index
    %c0_10 = arith.constant 0 : index
    %11 = vector.load %arg5[%c0_9, %c0_10] : memref<1x128xf32, #tpu.memory_space<vmem>>, vector<1x128xf32>
    %12 = vector.broadcast %11 : vector<1x128xf32> to vector<8x128xf32>
    %13 = arith.addf %10, %12 : vector<8x128xf32>
    %cst_11 = arith.constant 0.000000e+00 : f32
    %14 = vector.broadcast %cst_11 : f32 to vector<8x128xf32>
    %15 = arith.maximumf %13, %14 : vector<8x128xf32>
    %16 = arith.truncf %15 : vector<8x128xf32> to vector<8x128xbf16>
    %c0_12 = arith.constant 0 : index
    %c0_13 = arith.constant 0 : index
    %17 = vector.load %arg6[%c0_12, %c0_13] : memref<128x128xbf16, #tpu.memory_space<vmem>>, vector<128x128xbf16>
    %cst_14 = arith.constant dense<0.000000e+00> : vector<8x128xf32>
    %18 = tpu.matmul %16, %17, %cst_14 {dimension_numbers = #tpu.dot_dimension_numbers<[1], [0], [0], [1], [0, 0, 1, 1], [], []>} : vector<8x128xbf16>, vector<128x128xbf16>, vector<8x128xf32> -> vector<8x128xf32>
    %c0_15 = arith.constant 0 : index
    %c0_16 = arith.constant 0 : index
    %19 = vector.load %arg7[%c0_15, %c0_16] : memref<1x128xf32, #tpu.memory_space<vmem>>, vector<1x128xf32>
    %20 = vector.broadcast %19 : vector<1x128xf32> to vector<8x128xf32>
    %21 = arith.addf %18, %20 : vector<8x128xf32>
    %cst_17 = arith.constant 0.000000e+00 : f32
    %22 = vector.broadcast %cst_17 : f32 to vector<8x128xf32>
    %23 = arith.maximumf %21, %22 : vector<8x128xf32>
    %24 = arith.truncf %23 : vector<8x128xf32> to vector<8x128xbf16>
    %c0_18 = arith.constant 0 : index
    %c0_19 = arith.constant 0 : index
    %25 = vector.load %arg8[%c0_18, %c0_19] : memref<128x128xbf16, #tpu.memory_space<vmem>>, vector<128x128xbf16>
    %cst_20 = arith.constant dense<0.000000e+00> : vector<8x128xf32>
    %26 = tpu.matmul %24, %25, %cst_20 {dimension_numbers = #tpu.dot_dimension_numbers<[1], [0], [0], [1], [0, 0, 1, 1], [], []>} : vector<8x128xbf16>, vector<128x128xbf16>, vector<8x128xf32> -> vector<8x128xf32>
    %c0_21 = arith.constant 0 : index
    %c0_22 = arith.constant 0 : index
    %27 = vector.load %arg9[%c0_21, %c0_22] : memref<1x128xf32, #tpu.memory_space<vmem>>, vector<1x128xf32>
    %28 = vector.broadcast %27 : vector<1x128xf32> to vector<8x128xf32>
    %29 = arith.addf %26, %28 : vector<8x128xf32>
    %cst_23 = arith.constant 0.000000e+00 : f32
    %30 = vector.broadcast %cst_23 : f32 to vector<8x128xf32>
    %31 = arith.maximumf %29, %30 : vector<8x128xf32>
    %32 = arith.truncf %31 : vector<8x128xf32> to vector<8x128xbf16>
    %c0_24 = arith.constant 0 : index
    %c0_25 = arith.constant 0 : index
    %33 = vector.load %arg10[%c0_24, %c0_25] : memref<128x128xbf16, #tpu.memory_space<vmem>>, vector<128x128xbf16>
    %cst_26 = arith.constant dense<0.000000e+00> : vector<8x128xf32>
    %34 = tpu.matmul %32, %33, %cst_26 {dimension_numbers = #tpu.dot_dimension_numbers<[1], [0], [0], [1], [0, 0, 1, 1], [], []>} : vector<8x128xbf16>, vector<128x128xbf16>, vector<8x128xf32> -> vector<8x128xf32>
    %c0_27 = arith.constant 0 : index
    %c0_28 = arith.constant 0 : index
    %35 = vector.load %arg11[%c0_27, %c0_28] : memref<1x128xf32, #tpu.memory_space<vmem>>, vector<1x128xf32>
    %36 = vector.broadcast %35 : vector<1x128xf32> to vector<8x128xf32>
    %37 = arith.addf %34, %36 : vector<8x128xf32>
    %c0_29 = arith.constant 0 : index
    %c0_30 = arith.constant 0 : index
    %38 = vector.load %arg12[%c0_29, %c0_30] : memref<8x128xf32, #tpu.memory_space<vmem>>, vector<8x128xf32>
    tpu.vector_store %arg12[%c0_29, %c0_30], %37 {strides = array<i32>} : memref<8x128xf32, #tpu.memory_space<vmem>>, vector<8x128xf32>,
    return
  }
  func.func @transform_0(%arg0: i32) -> (i32, i32) {
    %c0_i32 = arith.constant 0 : i32
    %c0_i32_0 = arith.constant 0 : i32
    return %arg0, %c0_i32 : i32, i32
  }
  func.func @transform_1(%arg0: i32) -> (i32, i32) {
    %c0_i32 = arith.constant 0 : i32
    %c0_i32_0 = arith.constant 0 : i32
    %c0_i32_1 = arith.constant 0 : i32
    return %c0_i32, %c0_i32_0 : i32, i32
  }
  func.func @transform_2(%arg0: i32) -> (i32, i32) {
    %c0_i32 = arith.constant 0 : i32
    %c0_i32_0 = arith.constant 0 : i32
    %c0_i32_1 = arith.constant 0 : i32
    return %c0_i32, %c0_i32_0 : i32, i32
  }
  func.func @transform_3(%arg0: i32) -> (i32, i32) {
    %c0_i32 = arith.constant 0 : i32
    %c0_i32_0 = arith.constant 0 : i32
    %c0_i32_1 = arith.constant 0 : i32
    return %c0_i32, %c0_i32_0 : i32, i32
  }
  func.func @transform_4(%arg0: i32) -> (i32, i32) {
    %c0_i32 = arith.constant 0 : i32
    %c0_i32_0 = arith.constant 0 : i32
    %c0_i32_1 = arith.constant 0 : i32
    return %c0_i32, %c0_i32_0 : i32, i32
  }
  func.func @transform_5(%arg0: i32) -> (i32, i32) {
    %c0_i32 = arith.constant 0 : i32
    %c0_i32_0 = arith.constant 0 : i32
    %c0_i32_1 = arith.constant 0 : i32
    return %c0_i32, %c0_i32_0 : i32, i32
  }
  func.func @transform_6(%arg0: i32) -> (i32, i32) {
    %c0_i32 = arith.constant 0 : i32
    %c0_i32_0 = arith.constant 0 : i32
    %c0_i32_1 = arith.constant 0 : i32
    return %c0_i32, %c0_i32_0 : i32, i32
  }
  func.func @transform_7(%arg0: i32) -> (i32, i32) {
    %c0_i32 = arith.constant 0 : i32
    %c0_i32_0 = arith.constant 0 : i32
    %c0_i32_1 = arith.constant 0 : i32
    return %c0_i32, %c0_i32_0 : i32, i32
  }
  func.func @transform_8(%arg0: i32) -> (i32, i32) {
    %c0_i32 = arith.constant 0 : i32
    %c0_i32_0 = arith.constant 0 : i32
    %c0_i32_1 = arith.constant 0 : i32
    return %c0_i32, %c0_i32_0 : i32, i32
  }
  func.func @transform_9(%arg0: i32) -> (i32, i32) {
    %c0_i32 = arith.constant 0 : i32
    %c0_i32_0 = arith.constant 0 : i32
    %c0_i32_1 = arith.constant 0 : i32
    return %c0_i32, %c0_i32_0 : i32, i32
  }
  func.func @transform_10(%arg0: i32) -> (i32, i32) {
    %c0_i32 = arith.constant 0 : i32
    %c0_i32_0 = arith.constant 0 : i32
    %c0_i32_1 = arith.constant 0 : i32
    return %c0_i32, %c0_i32_0 : i32, i32
  }
  func.func @transform_11(%arg0: i32) -> (i32, i32) {
    %c0_i32 = arith.constant 0 : i32
    %c0_i32_0 = arith.constant 0 : i32
    return %arg0, %c0_i32 : i32, i32
  }
}

module attributes {stable_mosaic.version = 11 : i64} {
  func.func @_fcnet_kernel(%arg0: i32, %arg1: memref<8x784xbf16, #tpu.memory_space<vmem>>, %arg2: memref<784x128xbf16, #tpu.memory_space<vmem>>, %arg3: memref<1x128xf32, #tpu.memory_space<vmem>>, %arg4: memref<128x128xbf16, #tpu.memory_space<vmem>>, %arg5: memref<1x128xf32, #tpu.memory_space<vmem>>, %arg6: memref<128x128xbf16, #tpu.memory_space<vmem>>, %arg7: memref<1x128xf32, #tpu.memory_space<vmem>>, %arg8: memref<128x128xbf16, #tpu.memory_space<vmem>>, %arg9: memref<1x128xf32, #tpu.memory_space<vmem>>, %arg10: memref<128x128xbf16, #tpu.memory_space<vmem>>, %arg11: memref<1x128xf32, #tpu.memory_space<vmem>>, %arg12: memref<8x128xf32, #tpu.memory_space<vmem>>) attributes {dimension_semantics = [#tpu.dimension_semantics<parallel>], iteration_bounds = array<i64: 1>, scalar_prefetch = 0 : i64, scratch_operands = 0 : i64, tpu.core_type = #tpu.core_type<tc>, window_params = [{transform_indices = @transform_0, window_bounds = array<i64: 8, 784>}, {pipeline_mode = #tpu.pipeline_mode<synchronous>, transform_indices = @transform_1, window_bounds = array<i64: 784, 128>}, {pipeline_mode = #tpu.pipeline_mode<synchronous>, transform_indices = @transform_2, window_bounds = array<i64: 1, 128>}, {pipeline_mode = #tpu.pipeline_mode<synchronous>, transform_indices = @transform_3, window_bounds = array<i64: 128, 128>}, {pipeline_mode = #tpu.pipeline_mode<synchronous>, transform_indices = @transform_4, window_bounds = array<i64: 1, 128>}, {pipeline_mode = #tpu.pipeline_mode<synchronous>, transform_indices = @transform_5, window_bounds = array<i64: 128, 128>}, {pipeline_mode = #tpu.pipeline_mode<synchronous>, transform_indices = @transform_6, window_bounds = array<i64: 1, 128>}, {pipeline_mode = #tpu.pipeline_mode<synchronous>, transform_indices = @transform_7, window_bounds = array<i64: 128, 128>}, {pipeline_mode = #tpu.pipeline_mode<synchronous>, transform_indices = @transform_8, window_bounds = array<i64: 1, 128>}, {pipeline_mode = #tpu.pipeline_mode<synchronous>, transform_indices = @transform_9, window_bounds = array<i64: 128, 128>}, {pipeline_mode = #tpu.pipeline_mode<synchronous>, transform_indices = @transform_10, window_bounds = array<i64: 1, 128>}, {transform_indices = @transform_11, window_bounds = array<i64: 8, 128>}]} {
    %c0 = arith.constant 0 : index
    %c0_0 = arith.constant 0 : index
    %0 = vector.load %arg1[%c0, %c0_0] : memref<8x784xbf16, #tpu.memory_space<vmem>>, vector<8x784xbf16>
    %c0_1 = arith.constant 0 : index
    %c0_2 = arith.constant 0 : index
    %1 = vector.load %arg2[%c0_1, %c0_2] : memref<784x128xbf16, #tpu.memory_space<vmem>>, vector<784x128xbf16>
    %cst = arith.constant dense<0.000000e+00> : vector<8x128xf32>
    %2 = tpu.matmul %0, %1, %cst {dimension_numbers = #tpu.dot_dimension_numbers<[1], [0], [0], [1], [0, 0, 1, 1], [], []>} : vector<8x784xbf16>, vector<784x128xbf16>, vector<8x128xf32> -> vector<8x128xf32>
    %c0_3 = arith.constant 0 : index
    %c0_4 = arith.constant 0 : index
    %3 = vector.load %arg3[%c0_3, %c0_4] : memref<1x128xf32, #tpu.memory_space<vmem>>, vector<1x128xf32>
    %4 = vector.broadcast %3 : vector<1x128xf32> to vector<8x128xf32>
    %5 = arith.addf %2, %4 : vector<8x128xf32>
    %cst_5 = arith.constant 0.000000e+00 : f32
    %6 = vector.broadcast %cst_5 : f32 to vector<8x128xf32>
    %7 = arith.maximumf %5, %6 : vector<8x128xf32>
    %8 = arith.truncf %7 : vector<8x128xf32> to vector<8x128xbf16>
    %c0_6 = arith.constant 0 : index
    %c0_7 = arith.constant 0 : index
    %9 = vector.load %arg4[%c0_6, %c0_7] : memref<128x128xbf16, #tpu.memory_space<vmem>>, vector<128x128xbf16>
    %cst_8 = arith.constant dense<0.000000e+00> : vector<8x128xf32>
    %10 = tpu.matmul %8, %9, %cst_8 {dimension_numbers = #tpu.dot_dimension_numbers<[1], [0], [0], [1], [0, 0, 1, 1], [], []>} : vector<8x128xbf16>, vector<128x128xbf16>, vector<8x128xf32> -> vector<8x128xf32>
    %c0_9 = arith.constant 0 : index
    %c0_10 = arith.constant 0 : index
    %11 = vector.load %arg5[%c0_9, %c0_10] : memref<1x128xf32, #tpu.memory_space<vmem>>, vector<1x128xf32>
    %12 = vector.broadcast %11 : vector<1x128xf32> to vector<8x128xf32>
    %13 = arith.addf %10, %12 : vector<8x128xf32>
    %cst_11 = arith.constant 0.000000e+00 : f32
    %14 = vector.broadcast %cst_11 : f32 to vector<8x128xf32>
    %15 = arith.maximumf %13, %14 : vector<8x128xf32>
    %16 = arith.truncf %15 : vector<8x128xf32> to vector<8x128xbf16>
    %c0_12 = arith.constant 0 : index
    %c0_13 = arith.constant 0 : index
    %17 = vector.load %arg6[%c0_12, %c0_13] : memref<128x128xbf16, #tpu.memory_space<vmem>>, vector<128x128xbf16>
    %cst_14 = arith.constant dense<0.000000e+00> : vector<8x128xf32>
    %18 = tpu.matmul %16, %17, %cst_14 {dimension_numbers = #tpu.dot_dimension_numbers<[1], [0], [0], [1], [0, 0, 1, 1], [], []>} : vector<8x128xbf16>, vector<128x128xbf16>, vector<8x128xf32> -> vector<8x128xf32>
    %c0_15 = arith.constant 0 : index
    %c0_16 = arith.constant 0 : index
    %19 = vector.load %arg7[%c0_15, %c0_16] : memref<1x128xf32, #tpu.memory_space<vmem>>, vector<1x128xf32>
    %20 = vector.broadcast %19 : vector<1x128xf32> to vector<8x128xf32>
    %21 = arith.addf %18, %20 : vector<8x128xf32>
    %cst_17 = arith.constant 0.000000e+00 : f32
    %22 = vector.broadcast %cst_17 : f32 to vector<8x128xf32>
    %23 = arith.maximumf %21, %22 : vector<8x128xf32>
    %24 = arith.truncf %23 : vector<8x128xf32> to vector<8x128xbf16>
    %c0_18 = arith.constant 0 : index
    %c0_19 = arith.constant 0 : index
    %25 = vector.load %arg8[%c0_18, %c0_19] : memref<128x128xbf16, #tpu.memory_space<vmem>>, vector<128x128xbf16>
    %cst_20 = arith.constant dense<0.000000e+00> : vector<8x128xf32>
    %26 = tpu.matmul %24, %25, %cst_20 {dimension_numbers = #tpu.dot_dimension_numbers<[1], [0], [0], [1], [0, 0, 1, 1], [], []>} : vector<8x128xbf16>, vector<128x128xbf16>, vector<8x128xf32> -> vector<8x128xf32>
    %c0_21 = arith.constant 0 : index
    %c0_22 = arith.constant 0 : index
    %27 = vector.load %arg9[%c0_21, %c0_22] : memref<1x128xf32, #tpu.memory_space<vmem>>, vector<1x128xf32>
    %28 = vector.broadcast %27 : vector<1x128xf32> to vector<8x128xf32>
    %29 = arith.addf %26, %28 : vector<8x128xf32>
    %cst_23 = arith.constant 0.000000e+00 : f32
    %30 = vector.broadcast %cst_23 : f32 to vector<8x128xf32>
    %31 = arith.maximumf %29, %30 : vector<8x128xf32>
    %32 = arith.truncf %31 : vector<8x128xf32> to vector<8x128xbf16>
    %c0_24 = arith.constant 0 : index
    %c0_25 = arith.constant 0 : index
    %33 = vector.load %arg10[%c0_24, %c0_25] : memref<128x128xbf16, #tpu.memory_space<vmem>>, vector<128x128xbf16>
    %cst_26 = arith.constant dense<0.000000e+00> : vector<8x128xf32>
    %34 = tpu.matmul %32, %33, %cst_26 {dimension_numbers = #tpu.dot_dimension_numbers<[1], [0], [0], [1], [0, 0, 1, 1], [], []>} : vector<8x128xbf16>, vector<128x128xbf16>, vector<8x128xf32> -> vector<8x128xf32>
    %c0_27 = arith.constant 0 : index
    %c0_28 = arith.constant 0 : index
    %35 = vector.load %arg11[%c0_27, %c0_28] : memref<1x128xf32, #tpu.memory_space<vmem>>, vector<1x128xf32>
    %36 = vector.broadcast %35 : vector<1x128xf32> to vector<8x128xf32>
    %37 = arith.addf %34, %36 : vector<8x128xf32>
    %c0_29 = arith.constant 0 : index
    %c0_30 = arith.constant 0 : index
    %38 = vector.load %arg12[%c0_29, %c0_30] : memref<8x128xf32, #tpu.memory_space<vmem>>, vector<8x128xf32>
    tpu.vector_store %arg12[%c0_29, %c0_30], %37 {strides = array<i32>} : memref<8x128xf32, #tpu.memory_space<vmem>>, vector<8x128xf32>,
    return
  }
  func.func @transform_0(%arg0: i32) -> (i32, i32) {
    %c0_i32 = arith.constant 0 : i32
    %c0_i32_0 = arith.constant 0 : i32
    return %arg0, %c0_i32 : i32, i32
  }
  func.func @transform_1(%arg0: i32) -> (i32, i32) {
    %c0_i32 = arith.constant 0 : i32
    %c0_i32_0 = arith.constant 0 : i32
    %c0_i32_1 = arith.constant 0 : i32
    return %c0_i32, %c0_i32_0 : i32, i32
  }
  func.func @transform_2(%arg0: i32) -> (i32, i32) {
    %c0_i32 = arith.constant 0 : i32
    %c0_i32_0 = arith.constant 0 : i32
    %c0_i32_1 = arith.constant 0 : i32
    return %c0_i32, %c0_i32_0 : i32, i32
  }
  func.func @transform_3(%arg0: i32) -> (i32, i32) {
    %c0_i32 = arith.constant 0 : i32
    %c0_i32_0 = arith.constant 0 : i32
    %c0_i32_1 = arith.constant 0 : i32
    return %c0_i32, %c0_i32_0 : i32, i32
  }
  func.func @transform_4(%arg0: i32) -> (i32, i32) {
    %c0_i32 = arith.constant 0 : i32
    %c0_i32_0 = arith.constant 0 : i32
    %c0_i32_1 = arith.constant 0 : i32
    return %c0_i32, %c0_i32_0 : i32, i32
  }
  func.func @transform_5(%arg0: i32) -> (i32, i32) {
    %c0_i32 = arith.constant 0 : i32
    %c0_i32_0 = arith.constant 0 : i32
    %c0_i32_1 = arith.constant 0 : i32
    return %c0_i32, %c0_i32_0 : i32, i32
  }
  func.func @transform_6(%arg0: i32) -> (i32, i32) {
    %c0_i32 = arith.constant 0 : i32
    %c0_i32_0 = arith.constant 0 : i32
    %c0_i32_1 = arith.constant 0 : i32
    return %c0_i32, %c0_i32_0 : i32, i32
  }
  func.func @transform_7(%arg0: i32) -> (i32, i32) {
    %c0_i32 = arith.constant 0 : i32
    %c0_i32_0 = arith.constant 0 : i32
    %c0_i32_1 = arith.constant 0 : i32
    return %c0_i32, %c0_i32_0 : i32, i32
  }
  func.func @transform_8(%arg0: i32) -> (i32, i32) {
    %c0_i32 = arith.constant 0 : i32
    %c0_i32_0 = arith.constant 0 : i32
    %c0_i32_1 = arith.constant 0 : i32
    return %c0_i32, %c0_i32_0 : i32, i32
  }
  func.func @transform_9(%arg0: i32) -> (i32, i32) {
    %c0_i32 = arith.constant 0 : i32
    %c0_i32_0 = arith.constant 0 : i32
    %c0_i32_1 = arith.constant 0 : i32
    return %c0_i32, %c0_i32_0 : i32, i32
  }
  func.func @transform_10(%arg0: i32) -> (i32, i32) {
    %c0_i32 = arith.constant 0 : i32
    %c0_i32_0 = arith.constant 0 : i32
    %c0_i32_1 = arith.constant 0 : i32
    return %c0_i32, %c0_i32_0 : i32, i32
  }
  func.func @transform_11(%arg0: i32) -> (i32, i32) {
    %c0_i32 = arith.constant 0 : i32
    %c0_i32_0 = arith.constant 0 : i32
    return %arg0, %c0_i32 : i32, i32
  }
}

</mosaic_0001>

<bundles_post_ra>
// kernel: tpu_custom_call.1
= control target key start
LH: loop header
LB: loop body
LE: loop exit
PB: predicated region body
PF: predicated region fallthrough
CT: control target
= control target key end

     0   :  { %16 = vsyncpa [#allocation3], 0  ;;  %s1880_s0 = inlined_call_operand.hbm [shape: bf16[8,784], index: 0, kind: input, shape index: {}]   ;;  %s1881_s1 = inlined_call_operand.hbm [shape: bf16[784,128], index: 1, kind: input, shape index: {}]   ;;  %s1882_s2 = inlined_call_operand.vmem [shape: f32[1,128], index: 2, kind: input, shape index: {}]   ;;  %s1883_s3 = inlined_call_operand.hbm [shape: bf16[128,128], index: 3, kind: input, shape index: {}]   ;;  %s1884_s4 = inlined_call_operand.vmem [shape: f32[1,128], index: 4, kind: input, shape index: {}]   ;;  %s1885_s5 = inlined_call_operand.hbm [shape: bf16[128,128], index: 5, kind: input, shape index: {}]   ;;  %s1886_s6 = inlined_call_operand.vmem [shape: f32[1,128], index: 6, kind: input, shape index: {}]   ;;  %s1887_s7 = inlined_call_operand.hbm [shape: bf16[128,128], index: 7, kind: input, shape index: {}]   ;;  %s1888_s8 = inlined_call_operand.vmem [shape: f32[1,128], index: 8, kind: input, shape index: {}]   ;;  %s1889_s9 = inlined_call_operand.hbm [shape: bf16[128,128], index: 9, kind: input, shape index: {}]   ;;  %s1890_s10 = inlined_call_operand.vmem [shape: f32[1,128], index: 10, kind: input, shape index: {}]   ;;  %s1891_s11 = inlined_call_operand.hbm [shape: f32[8,128], index: 11, kind: output, shape index: {}]  }
   0x1   :  { %17 = vsyncpa [#allocation6], 0 }
   0x2   :  { %18 = vsyncpa [#allocation9], 0 }
   0x3   :  { %19 = vsyncpa [#allocation12], 0 }
   0x4   :  { %20 = vsyncpa [#allocation4], 0  ;;  %s1715_s17 = smov [#allocation5]  }
   0x5   :  { %s36_s18 = sshll.u32 %s1715_s17, 4  ;;  %s37_s18 = int_to_ptr.vmem [resolvable:$true] %s36_s18 }
   0x6   :  { %s1573_s19 = scalar_lea.vmem %s37_s18, 6272  ;;  %p1578_p1 = scmp.lt.s32.totalorder %s37_s18, %s37_s18 }
   0x7   :  { %p1574_p0 = scmp.ne.s32.totalorder %s37_s18, %s1573_s19  ;;  %p1579_p2 = scmp.lt.s32.totalorder %s1573_s19, %s1573_s19 }
   0x9   :  { %p1580_p3 = por %p1579_p2, %p1578_p1 }
   0xb   :  { %p1581_p4 = pnand %p1580_p3, %p1574_p0 }
   0xd   :  { %1584 = shalt.err (!%p1581_p4)
}
   0xe   :  { %s1716_s20 = smov 64   ;;  %s1717_s21 = smov 4  }
   0xf   :  { %42 = dma.hbm_to_vmem [thread:$0]  %s1881_s1, 6272, %s37_s18, [#allocation6], %s1716_s20, %s1716_s20, %s1717_s21  }
  0x10   :  { %s1718_s24 = smov [#allocation8]   ;;  %s1719_s26 = smov [#allocation2]  }
  0x11   :  { %s64_s25 = sshll.u32 %s1718_s24, 4  ;;  %s27_s27 = sshll.u32 %s1719_s26, 4  ;;  %s65_s25 = int_to_ptr.vmem [resolvable:$true] %s64_s25  ;;  %s28_s27 = int_to_ptr.vmem [resolvable:$true] %s27_s27 }
  0x12   :  { %s1593_s28 = scalar_lea.vmem %s65_s25, 1024  ;;  %p1598_p6 = scmp.lt.s32.totalorder %s65_s25, %s65_s25 }
  0x13   :  { %p1594_p5 = scmp.ne.s32.totalorder %s65_s25, %s1593_s28  ;;  %p1599_p7 = scmp.lt.s32.totalorder %s1593_s28, %s1593_s28 }
  0x15   :  { %p1600_p8 = por %p1599_p7, %p1598_p6 }
  0x17   :  { %p1601_p9 = pnand %p1600_p8, %p1594_p5 }
  0x19   :  { %1604 = shalt.err (!%p1601_p9)
}
  0x1a   :  { %70 = dma.hbm_to_vmem [thread:$0]  %s1885_s5, 1024, %s65_s25, [#allocation9], %s1716_s20, %s1716_s20, %s1717_s21  }
  0x1b   :  { %s1613_s1 = scalar_lea.vmem %s28_s27, 448  ;;  %p1618_p11 = scmp.lt.s32.totalorder %s28_s27, %s28_s27 }
  0x1c   :  { %p1614_p10 = scmp.ne.s32.totalorder %s28_s27, %s1613_s1  ;;  %p1619_p12 = scmp.lt.s32.totalorder %s1613_s1, %s1613_s1 }
  0x1e   :  { %p1620_p13 = por %p1619_p12, %p1618_p11 }
  0x20   :  { %p1621_p0 = pnand %p1620_p13, %p1614_p10 }
  0x22   :  { %1624 = shalt.err (!%p1621_p0)
}
  0x23   :  { %30 = dma.hbm_to_vmem [thread:$0]  %s1880_s0, 448, %s28_s27, [#allocation3]  }
  0x24   :  { %s1720_s14 = smov [#allocation7]   ;;  %s1721_s16 = smov [#allocation10]  }
  0x25   :  { %s50_s15 = sshll.u32 %s1720_s14, 4  ;;  %s78_s17 = sshll.u32 %s1721_s16, 4  ;;  %s51_s15 = int_to_ptr.vmem [resolvable:$true] %s50_s15  ;;  %s79_s17 = int_to_ptr.vmem [resolvable:$true] %s78_s17 }
  0x26   :  { %s1633_s18 = scalar_lea.vmem %s51_s15, 1024  ;;  %p1638_p2 = scmp.lt.s32.totalorder %s51_s15, %s51_s15 }
  0x27   :  { %p1634_p1 = scmp.ne.s32.totalorder %s51_s15, %s1633_s18  ;;  %p1639_p3 = scmp.lt.s32.totalorder %s1633_s18, %s1633_s18 }
  0x29   :  { %p1640_p4 = por %p1639_p3, %p1638_p2 }
  0x2b   :  { %p1641_p5 = pnand %p1640_p4, %p1634_p1 }
  0x2d   :  { %1644 = shalt.err (!%p1641_p5)
}
  0x2e   :  { %56 = dma.hbm_to_vmem [thread:$0]  %s1883_s3, 1024, %s51_s15, [#allocation6], %s1716_s20, %s1716_s20, %s1717_s21  }
  0x2f   :  { %s1653_s0 = scalar_lea.vmem %s79_s17, 1024  ;;  %p1658_p7 = scmp.lt.s32.totalorder %s79_s17, %s79_s17 }
  0x30   :  { %p1654_p6 = scmp.ne.s32.totalorder %s79_s17, %s1653_s0  ;;  %p1659_p8 = scmp.lt.s32.totalorder %s1653_s0, %s1653_s0 }
  0x32   :  { %p1660_p9 = por %p1659_p8, %p1658_p7 }
  0x34   :  { %p1661_p10 = pnand %p1660_p9, %p1654_p6 }
  0x36   :  { %1664 = shalt.err (!%p1661_p10)
}
  0x37   :  { %84 = dma.hbm_to_vmem [thread:$0]  %s1887_s7, 1024, %s79_s17, [#allocation9], %s1716_s20, %s1716_s20, %s1717_s21  }
  0x38   :  { %s1722_s24 = smov [#allocation11]  }
  0x39   :  { %s92_s25 = sshll.u32 %s1722_s24, 4  ;;  %s93_s25 = int_to_ptr.vmem [resolvable:$true] %s92_s25 }
  0x3a   :  { %s1673_s26 = scalar_lea.vmem %s93_s25, 1024  ;;  %p1678_p12 = scmp.lt.s32.totalorder %s93_s25, %s93_s25 }
  0x3b   :  { %p1674_p11 = scmp.ne.s32.totalorder %s93_s25, %s1673_s26  ;;  %p1679_p13 = scmp.lt.s32.totalorder %s1673_s26, %s1673_s26 }
  0x3d   :  { %p1680_p0 = por %p1679_p13, %p1678_p12 }
  0x3f   :  { %p1681_p1 = pnand %p1680_p0, %p1674_p11 }
  0x41   :  { %1684 = shalt.err (!%p1681_p1)
}
  0x42   :  { %98 = dma.hbm_to_vmem [thread:$0]  %s1889_s9, 1024, %s93_s25, [#allocation12], %s1716_s20, %s1716_s20, %s1717_s21  }
  0x43   :  { %1705 = dma.done.wait [#allocation3], 448  }
  0x44   :  { %1706 = vsyncadd [#allocation3], 4294966848 }
  0x45   :  { %1707 = dma.done.wait [#allocation6], 7296  }
  0x46   :  { %1708 = vsyncadd [#allocation6], 4294960000 }
  0x47   :  { %1709 = dma.done.wait [#allocation9], 2048  }
  0x48   :  { %1710 = vsyncadd [#allocation9], 4294965248 }
  0x49   :  { %1711 = dma.done.wait [#allocation12], 1024  }
  0x4a   :  { %1712 = vsyncadd [#allocation12], 4294966272  ;;  %v1477_v0 = vld [vmem:[#allocation5 + $0x78] sm:$0xff]   ;;  %v1481_v4 = vld [vmem:[#allocation5 + $0x70] sm:$0xff]   ;;  %v1723_v43 = vmov 0.0   ;;  %vm1724_vm0 = vmmov 0  }
  0x4b   :  { %v1478_v1 = vld [vmem:[#allocation5 + $0x38] sm:$0xff]   ;;  %1276 = vmatprep.subr.bf16.mxu0 %v1477_v0  ;;  %v1482_v5 = vld [vmem:[#allocation5 + $0x30] sm:$0xff]   ;;  %v1485_v8 = vld [vmem:[#allocation5 + $0x68] sm:$0xff]   ;;  %vm547_vm1 = vcmask 130048   ;;  %s1725_s1 = smov [#allocation13]  }
  0x4c   :  { %v1479_v2 = vld [vmem:[#allocation5 + $0xf8] sm:$0xff]   ;;  %1277 = vmatpush3.bf16.msra.mxu0 %v1478_v1  ;;  %v1483_v6 = vld [vmem:[#allocation5 + $0xf0] sm:$0xff]   ;;  %v1486_v9 = vld [vmem:[#allocation5 + $0x28] sm:$0xff]   ;;  %s1170_s12 = sshll.u32 %s1725_s1, 4  ;;  %s1171_s12 = int_to_ptr.vmem [resolvable:$true] %s1170_s12 }
  0x4d   :  { %v1480_v3 = vld [vmem:[#allocation5 + $0xb8] sm:$0xff]   ;;  %1298 = vmatprep.subr.bf16.mxu1 %v1479_v2  ;;  %1278 = vmatprep.subr.bf16.mxu0 %v1481_v4  ;;  %v1484_v7 = vld [vmem:[#allocation5 + $0xb0] sm:$0xff]   ;;  %v1487_v10 = vld [vmem:[#allocation5 + $0xe8] sm:$0xff]   ;;  %p1690_p3 = scmp.lt.s32.totalorder %s1171_s12, %s1171_s12 }
  0x4e   :  { %1299 = vmatpush3.bf16.msra.mxu1 %v1480_v3  ;;  %v1488_v11 = vld [vmem:[#allocation5 + $0xa8] sm:$0xff]   ;;  %v1489_v12 = vld [vmem:[#allocation5 + $0x60] sm:$0xff]   ;;  %v1493_v16 = vld [vmem:[#allocation5 + $0x58] sm:$0xff]  }
  0x4f   :  { %1300 = vmatprep.subr.bf16.mxu1 %v1483_v6  ;;  %v1490_v13 = vld [vmem:[#allocation5 + $0x20] sm:$0xff]   ;;  %v1494_v17 = vld [vmem:[#allocation5 + $0x18] sm:$0xff]   ;;  %v1497_v20 = vld [vmem:[#allocation5 + $0x50] sm:$0xff]  }
  0x50   :  { %1279 = vmatpush3.bf16.msra.mxu0 %v1482_v5  ;;  %v1491_v14 = vld [vmem:[#allocation5 + $0xe0] sm:$0xff]   ;;  %v1495_v18 = vld [vmem:[#allocation5 + $0xd8] sm:$0xff]   ;;  %v1498_v21 = vld [vmem:[#allocation5 + $0x10] sm:$0xff]  }
  0x51   :  { %1280 = vmatprep.subr.bf16.mxu0 %v1485_v8  ;;  %v1492_v15 = vld [vmem:[#allocation5 + $0xa0] sm:$0xff]   ;;  %v1496_v19 = vld [vmem:[#allocation5 + $0x98] sm:$0xff]   ;;  %v1499_v22 = vld [vmem:[#allocation5 + $0xd0] sm:$0xff]  }
  0x52   :  { %1301 = vmatpush3.bf16.msra.mxu1 %v1484_v7  ;;  %v1500_v23 = vld [vmem:[#allocation5 + $0x90] sm:$0xff]   ;;  %v1501_v24 = vld [vmem:[#allocation5 + $0x48] sm:$0xff]   ;;  %v1505_v28 = vld [vmem:[#allocation5 + $0x40] sm:$0xff]  }
  0x53   :  { %1302 = vmatprep.subr.bf16.mxu1 %v1487_v10  ;;  %v1502_v25 = vld [vmem:[#allocation5 + $0x8] sm:$0xff]   ;;  %v1506_v29 = vld [vmem:[#allocation5] sm:$0xff]   ;;  %v1511_v35 = vld [vmem:[#allocation5 + $0x178] sm:$0xff]  }
  0x54   :  { %1281 = vmatpush3.bf16.msra.mxu0 %v1486_v9  ;;  %v1503_v26 = vld [vmem:[#allocation5 + $0xc8] sm:$0xff]   ;;  %v1507_v30 = vld [vmem:[#allocation5 + $0xc0] sm:$0xff]   ;;  %v1514_v39 = vld [vmem:[#allocation5 + $0x138] sm:$0xff]  }
  0x55   :  { %1282 = vmatprep.subr.bf16.mxu0 %v1489_v12  ;;  %v1504_v27 = vld [vmem:[#allocation5 + $0x88] sm:$0xff]   ;;  %v1510_v34 = vld [vmem:[#allocation5 + $0x80] sm:$0xff]   ;;  %v1515_v40 = vld [vmem:[#allocation5 + $0x170] sm:$0xff]  }
  0x56   :  { %1303 = vmatpush3.bf16.msra.mxu1 %v1488_v11  ;;  %v120_v31 = vld [vmem:[#allocation2] sm:$0xff]  ;;  %v121_v36 = vld [vmem:[#allocation2 + $0x8] sm:$0xff]  ;;  %v1521_v47 = vld [vmem:[#allocation5 + $0x158] sm:$0xff]  }
  0x57   :  { %1304 = vmatprep.subr.bf16.mxu1 %v1491_v14  ;;  %v1183_v32 = vcombine.low %v120_v31, %v120_v31  ;;  %v1184_v33 = vcombine.high %v120_v31, %v120_v31  ;;  %v1185_v37 = vcombine.low %v121_v36, %v121_v36  ;;  %v1186_v38 = vcombine.high %v121_v36, %v121_v36  ;;  %v1516_v41 = vld [vmem:[#allocation5 + $0x130] sm:$0xff]   ;;  %v1517_v42 = vld [vmem:[#allocation5 + $0x168] sm:$0xff]   ;;  %v1519_v45 = vld [vmem:[#allocation5 + $0x160] sm:$0xff]  }
  0x58   :  { %1283 = vmatpush3.bf16.msra.mxu0 %v1490_v13  ;;  %v1518_v44 = vld [vmem:[#allocation5 + $0x128] sm:$0xff]   ;;  %v1520_v46 = vld [vmem:[#allocation5 + $0x120] sm:$0xff]   ;;  %v1522_v48 = vld [vmem:[#allocation5 + $0x118] sm:$0xff]  }
  0x59   :  { %1284 = vmatprep.subr.bf16.mxu0 %v1493_v16  ;;  %583 = vmatprep.mubr.bf16.mxu0 %v1184_v33  ;;  %v1523_v49 = vld [vmem:[#allocation5 + $0x150] sm:$0xff]   ;;  %v1529_v50 = vld [vmem:[#allocation5 + $0x180] sm:$0xff]   ;;  %v1532_v54 = vld [vmem:[#allocation2 + $0x18] ss:$0 sps:$4 sm:$0xff]  }
  0x5a   :  { %1305 = vmatpush3.bf16.msra.mxu1 %v1492_v15  ;;  %623 = vmatprep.mubr.bf16.mxu1 %v1186_v38  ;;  %v122_v51 = vld [vmem:[#allocation2 + $0x10] sm:$0xff]  ;;  %v1525_v55 = vld [vmem:[#allocation5 + $0x148] sm:$0xff]   ;;  %v1527_v57 = vld [vmem:[#allocation5 + $0x140] sm:$0xff]  }
  0x5b   :  { %1306 = vmatprep.subr.bf16.mxu1 %v1495_v18  ;;  %v1524_v52 = vld [vmem:[#allocation5 + $0x110] sm:$0xff]   ;;  %v1188_v53 = vcombine.high %v122_v51, %v122_v51  ;;  %v1526_v56 = vld [vmem:[#allocation5 + $0x108] sm:$0xff]   ;;  %v1528_v58 = vld [vmem:[#allocation5 + $0x100] sm:$0xff]   ;;  %v1187_v59 = vcombine.low %v122_v51, %v122_v51 }
  0x5c   :  { %1285 = vmatpush3.bf16.msra.mxu0 %v1494_v17  ;;  %v1533_v60 = vld [vmem:[#allocation7 + $0x38] sm:$0xff]   ;;  %v1534_v61 = vld [vmem:[#allocation7 + $0x30] sm:$0xff]   ;;  %v1535_v62 = vld [vmem:[#allocation7 + $0x28] sm:$0xff]  }
  0x5d   :  { %1286 = vmatprep.subr.bf16.mxu0 %v1497_v20  ;;  %v1536_v63 = vld [vmem:[#allocation7 + $0x20] sm:$0xff]   ;;  %v1537_v0 = vld [vmem:[#allocation7 + $0x18] sm:$0xff]   ;;  %v1538_v1 = vld [vmem:[#allocation7 + $0x10] sm:$0xff]  }
  0x5e   :  { %1307 = vmatpush3.bf16.msra.mxu1 %v1496_v19  ;;  %v1539_v2 = vld [vmem:[#allocation7 + $0x8] sm:$0xff]   ;;  %v1540_v3 = vld [vmem:[#allocation7] sm:$0xff]   ;;  %v1541_v4 = vld [vmem:[#allocation8 + $0x38] sm:$0xff]  }
  0x5f   :  { %1308 = vmatprep.subr.bf16.mxu1 %v1499_v22  ;;  %v1542_v5 = vld [vmem:[#allocation8 + $0x30] sm:$0xff]   ;;  %v1543_v6 = vld [vmem:[#allocation8 + $0x28] sm:$0xff]   ;;  %v1544_v7 = vld [vmem:[#allocation8 + $0x20] sm:$0xff]  }
  0x60   :  { %1287 = vmatpush3.bf16.msra.mxu0 %v1498_v21  ;;  %v1545_v8 = vld [vmem:[#allocation8 + $0x18] sm:$0xff]   ;;  %v1546_v9 = vld [vmem:[#allocation8 + $0x10] sm:$0xff]   ;;  %v1547_v36 = vld [vmem:[#allocation8 + $0x8] sm:$0xff]  }
  0x61   :  { %1288 = vmatprep.subr.bf16.mxu0 %v1501_v24  ;;  %v1549_v38 = vld [vmem:[#allocation10 + $0x38] sm:$0xff]  }
  0x62   :  { %1309 = vmatpush3.bf16.msra.mxu1 %v1500_v23  ;;  %v1182_v23 = vld [vmem:[%s1882_s2] ss:$0 sm:$0xff] }
  0x63   :  { %1310 = vmatprep.subr.bf16.mxu1 %v1503_v26 }
  0x64   :  { %1289 = vmatpush3.bf16.msra.mxu0 %v1502_v25 }
  0x65   :  { %1290 = vmatprep.subr.bf16.mxu0 %v1505_v28 }
  0x66   :  { %1311 = vmatpush3.bf16.msra.mxu1 %v1504_v27 }
  0x67   :  { %1312 = vmatprep.subr.bf16.mxu1 %v1507_v30 }
  0x68   :  { %1291 = vmatpush3.bf16.msra.mxu0 %v1506_v29 }
  0x69   :  { %1320 = vmatprep.subr.bf16.mxu0 %v1511_v35 }
  0x6a   :  { %1313 = vmatpush3.bf16.msra.mxu1 %v1510_v34 }
  0x6b   :  { %584 = vmatmul.mubr.bf16.vlgmr.msra.gmra.mxu0 %v1183_v32  ;;  %1380 = vmatprep.subr.bf16.mxu1 %v1723_v43 }
  0x6c   :  { %1321 = vmatpush3.bf16.msra.mxu0 %v1514_v39  ;;  %663 = vmatprep.mubr.bf16.mxu0 %v1188_v53  ;;  %v1550_v39 = vld [vmem:[#allocation10 + $0x30] sm:$0xff]   ;;  %v1555_v53 = vld [vmem:[#allocation10 + $0x8] sm:$0xff]  }
  0x6d   :  { %624 = vmatmul.mubr.bf16.vlgmr.msra.gmra.mxu1 %v1185_v37  ;;  %1322 = vmatprep.subr.bf16.mxu0 %v1515_v40  ;;  %v1548_v37 = vld [vmem:[#allocation8] sm:$0xff]   ;;  %v1551_v40 = vld [vmem:[#allocation10 + $0x28] sm:$0xff]  }
  0x6e   :  { %1382 = vmatprep.mubr.msk.bf16.mxu1 %vm1724_vm0, %v1723_v43  ;;  %1381 = vmatpush3.bf16.msra.mxu1 %v1529_v50 }
  0x6f   :  { %1386 = vmatprep.subr.bf16.mxu1 %v1723_v43 }
  0x70   :  { %1323 = vmatpush3.bf16.msra.mxu0 %v1516_v41  ;;  %v1552_v41 = vld [vmem:[#allocation10 + $0x20] sm:$0xff]  }
  0x71   :  { %1324 = vmatprep.subr.bf16.mxu0 %v1517_v42  ;;  %v1553_v42 = vld [vmem:[#allocation10 + $0x18] sm:$0xff]  }
  0x74   :  { %1325 = vmatpush3.bf16.msra.mxu0 %v1518_v44  ;;  %v1554_v44 = vld [vmem:[#allocation10 + $0x10] sm:$0xff]  }
  0x75   :  { %1326 = vmatprep.subr.bf16.mxu0 %v1519_v45  ;;  %1383 = vmatmul.mubr.msk.bf16.vlgmr.msra.gmra.mxu1 %vm547_vm1, %v1532_v54  ;;  %v1240_v45 = vld [vmem:[%s1884_s4] ss:$0 sm:$0xff]  ;;  %v1556_v54 = vld [vmem:[#allocation10] sm:$0xff]  }
  0x76   :  { %1402 = vmatprep.mubr.msk.bf16.mxu1 %vm1724_vm0, %v1723_v43  ;;  %1387 = vmatpush3.bf16.msra.mxu1 %v1533_v60  ;;  %v1562_v60 = vld [vmem:[#allocation11 + $0x10] sm:$0xff]  }
  0x77   :  { %1388 = vmatprep.subr.bf16.mxu1 %v1723_v43 }
  0x78   :  { %1327 = vmatpush3.bf16.msra.mxu0 %v1520_v46 }
  0x79   :  { %1328 = vmatprep.subr.bf16.mxu0 %v1521_v47 }
  0x7a   :  { %1389 = vmatpush3.bf16.msra.mxu1 %v1534_v61  ;;  %v1249_v61 = vld [vmem:[%s1886_s6] ss:$0 sm:$0xff] }
  0x7b   :  { %1390 = vmatprep.subr.bf16.mxu1 %v1723_v43 }
  0x7c   :  { %1329 = vmatpush3.bf16.msra.mxu0 %v1522_v48 }
  0x7d   :  { %1330 = vmatprep.subr.bf16.mxu0 %v1523_v49 }
  0x7e   :  { %1391 = vmatpush3.bf16.msra.mxu1 %v1535_v62 }
  0x7f   :  { %1392 = vmatprep.subr.bf16.mxu1 %v1723_v43 }
  0x80   :  { %1331 = vmatpush3.bf16.msra.mxu0 %v1524_v52 }
  0x81   :  { %1332 = vmatprep.subr.bf16.mxu0 %v1525_v55  ;;  %v1557_v55 = vld [vmem:[#allocation11 + $0x38] sm:$0xff]  }
  0x82   :  { %1393 = vmatpush3.bf16.msra.mxu1 %v1536_v63 }
  0x83   :  { %1394 = vmatprep.subr.bf16.mxu1 %v1723_v43 }
  0x84   :  { %1333 = vmatpush3.bf16.msra.mxu0 %v1526_v56  ;;  %v1558_v56 = vld [vmem:[#allocation11 + $0x30] sm:$0xff]  }
  0x85   :  { %1334 = vmatprep.subr.bf16.mxu0 %v1527_v57  ;;  %v1559_v57 = vld [vmem:[#allocation11 + $0x28] sm:$0xff]  }
  0x86   :  { %1395 = vmatpush3.bf16.msra.mxu1 %v1537_v0 }
  0x87   :  { %1396 = vmatprep.subr.bf16.mxu1 %v1723_v43 }
  0x88   :  { %1335 = vmatpush3.bf16.msra.mxu0 %v1528_v58  ;;  %v1560_v58 = vld [vmem:[#allocation11 + $0x20] sm:$0xff]  }
  0x89   :  { %1406 = vmatprep.subr.bf16.mxu0 %v1723_v43 }
  0x8a   :  { %1397 = vmatpush3.bf16.msra.mxu1 %v1538_v1 }
  0x8b   :  { %664 = vmatmul.mubr.bf16.vlgmr.msra.gmra.mxu0 %v1187_v59  ;;  %1398 = vmatprep.subr.bf16.mxu1 %v1723_v43  ;;  %v1561_v59 = vld [vmem:[#allocation11 + $0x18] sm:$0xff]  }
  0x8c   :  { %1422 = vmatprep.mubr.msk.bf16.mxu0 %vm1724_vm0, %v1723_v43  ;;  %1407 = vmatpush3.bf16.msra.mxu0 %v1541_v4 }
  0x8d   :  { %1408 = vmatprep.subr.bf16.mxu0 %v1723_v43 }
  0x8e   :  { %1399 = vmatpush3.bf16.msra.mxu1 %v1539_v2 }
  0x8f   :  { %1400 = vmatprep.subr.bf16.mxu1 %v1723_v43 }
  0x90   :  { %1409 = vmatpush3.bf16.msra.mxu0 %v1542_v5  ;;  %v1563_v5 = vld [vmem:[#allocation11 + $0x8] sm:$0xff]  }
  0x91   :  { %1410 = vmatprep.subr.bf16.mxu0 %v1723_v43 }
  0x92   :  { %1401 = vmatpush3.bf16.msra.mxu1 %v1540_v3 }
  0x93   :  { %1426 = vmatprep.subr.bf16.mxu1 %v1723_v43 }
  0x94   :  { %1411 = vmatpush3.bf16.msra.mxu0 %v1543_v6  ;;  %v1564_v6 = vld [vmem:[#allocation11] sm:$0xff]  }
  0x95   :  { %1412 = vmatprep.subr.bf16.mxu0 %v1723_v43 }
  0x98   :  { %1413 = vmatpush3.bf16.msra.mxu0 %v1544_v7  ;;  %v1258_v7 = vld [vmem:[%s1888_s8] ss:$0 sm:$0xff]  ;;  %s1685_s8 = scalar_lea.vmem %s1171_s12, 128 }
  0x99   :  { %1414 = vmatprep.subr.bf16.mxu0 %v1723_v43  ;;  %p1686_p2 = scmp.ne.s32.totalorder %s1171_s12, %s1685_s8  ;;  %p1691_p4 = scmp.lt.s32.totalorder %s1685_s8, %s1685_s8 }
  0x9b   :  { %p1692_p5 = por %p1691_p4, %p1690_p3 }
  0x9c   :  { %1415 = vmatpush3.bf16.msra.mxu0 %v1545_v8 }
  0x9d   :  { %1416 = vmatprep.subr.bf16.mxu0 %v1723_v43  ;;  %p1693_p6 = pnand %p1692_p5, %p1686_p2 }
  0xa0   :  { %1417 = vmatpush3.bf16.msra.mxu0 %v1546_v9 }
  0xa1   :  { %1418 = vmatprep.subr.bf16.mxu0 %v1723_v43 }
  0xa4   :  { %1419 = vmatpush3.bf16.msra.mxu0 %v1547_v36 }
  0xa5   :  { %1420 = vmatprep.subr.bf16.mxu0 %v1723_v43 }
  0xa8   :  { %1421 = vmatpush3.bf16.msra.mxu0 %v1548_v37 }
  0xa9   :  { %1446 = vmatprep.subr.bf16.mxu0 %v1723_v43 }
 0x12b   :  { %v1292_v10 = vpop.f32.mrf.mxu0 }
 0x12d   :  { %v1293_v11 = vpop.f32.mrf.mxu0  ;;  %v1314_v12 = vpop.f32.mrf.mxu1 }
 0x12e   :  { %v1294_v22 = vadd.f32 %v1293_v11, %v1292_v10 }
 0x12f   :  { %v1295_v13 = vpop.f32.mrf.mxu0  ;;  %v1315_v14 = vpop.f32.mrf.mxu1 }
 0x130   :  { %v586_v24 = vadd.f32 %v1294_v22, %v1182_v23  ;;  %v1316_v25 = vadd.f32 %v1315_v14, %v1314_v12 }
 0x131   :  { %v1296_v15 = vpop.f32.mrf.mxu0  ;;  %v1317_v16 = vpop.f32.mrf.mxu1 }
 0x132   :  { %v626_v28 = vadd.f32 %v1316_v25, %v586_v24  ;;  %v1267_v15 = vld [vmem:[%s1890_s10] ss:$0 sm:$0xff] }
 0x133   :  { %v1318_v17 = vpop.f32.mrf.mxu1 }
 0x135   :  { %v705_v18 = vpop.f32.mrf.mxu1 }
 0x137   :  { %v1384_v19 = vpop.f32.mrf.mxu1 }
 0x139   :  { %v708_v20 = vpop.f32.mrf.mxu1 }
 0x13b   :  { %v1385_v21 = vpop.f32.mrf.mxu1 }
 0x14b   :  { %v1336_v26 = vpop.f32.mrf.mxu0 }
 0x14d   :  { %v1337_v27 = vpop.f32.mrf.mxu0 }
 0x14e   :  { %v1338_v29 = vadd.f32 %v1337_v27, %v1336_v26 }
 0x14f   :  { %v1339_v30 = vpop.f32.mrf.mxu0 }
 0x150   :  { %v666_v31 = vadd.f32 %v1338_v29, %v626_v28 }
 0x151   :  { %v1340_v32 = vpop.f32.mrf.mxu0 }
 0x152   :  { %v706_v33 = vadd.f32 %v705_v18, %v666_v31 }
 0x154   :  { %v711_v34 = vmax.f32 %v706_v33, 0.0 }
 0x156   :  { %v712_v35 = vpack.c.bf16 %v711_v34, %v711_v34 }
 0x158   :  { %1403 = vmatmul.mubr.bf16.vlgmr.msra.gmra.mxu1 %v712_v35 }
 0x159   :  { %1442 = vmatprep.mubr.msk.bf16.mxu1 %vm1724_vm0, %v1723_v43  ;;  %1427 = vmatpush3.bf16.msra.mxu1 %v1549_v38 }
 0x15a   :  { %1428 = vmatprep.subr.bf16.mxu1 %v1723_v43 }
 0x15d   :  { %1429 = vmatpush3.bf16.msra.mxu1 %v1550_v39 }
 0x15e   :  { %1430 = vmatprep.subr.bf16.mxu1 %v1723_v43 }
 0x161   :  { %1431 = vmatpush3.bf16.msra.mxu1 %v1551_v40 }
 0x162   :  { %1432 = vmatprep.subr.bf16.mxu1 %v1723_v43 }
 0x165   :  { %1433 = vmatpush3.bf16.msra.mxu1 %v1552_v41 }
 0x166   :  { %1434 = vmatprep.subr.bf16.mxu1 %v1723_v43 }
 0x169   :  { %1435 = vmatpush3.bf16.msra.mxu1 %v1553_v42 }
 0x16a   :  { %1436 = vmatprep.subr.bf16.mxu1 %v1723_v43 }
 0x16d   :  { %1437 = vmatpush3.bf16.msra.mxu1 %v1554_v44 }
 0x16e   :  { %1438 = vmatprep.subr.bf16.mxu1 %v1723_v43 }
 0x171   :  { %1439 = vmatpush3.bf16.msra.mxu1 %v1555_v53 }
 0x172   :  { %1440 = vmatprep.subr.bf16.mxu1 %v1723_v43 }
 0x175   :  { %1441 = vmatpush3.bf16.msra.mxu1 %v1556_v54 }
 0x218   :  { %v818_v46 = vpop.f32.mrf.mxu1 }
 0x219   :  { %v819_v47 = vadd.f32 %v1240_v45, %v818_v46 }
 0x21a   :  { %v1404_v48 = vpop.f32.mrf.mxu1 }
 0x21b   :  { %v824_v49 = vmax.f32 %v819_v47, 0.0 }
 0x21c   :  { %v821_v50 = vpop.f32.mrf.mxu1 }
 0x21d   :  { %v825_v51 = vpack.c.bf16 %v824_v49, %v824_v49 }
 0x21e   :  { %v1405_v52 = vpop.f32.mrf.mxu1 }
 0x21f   :  { %1423 = vmatmul.mubr.bf16.vlgmr.msra.gmra.mxu0 %v825_v51 }
 0x220   :  { %1462 = vmatprep.mubr.msk.bf16.mxu0 %vm1724_vm0, %v1723_v43  ;;  %1447 = vmatpush3.bf16.msra.mxu0 %v1557_v55 }
 0x221   :  { %1448 = vmatprep.subr.bf16.mxu0 %v1723_v43 }
 0x224   :  { %1449 = vmatpush3.bf16.msra.mxu0 %v1558_v56 }
 0x225   :  { %1450 = vmatprep.subr.bf16.mxu0 %v1723_v43 }
 0x228   :  { %1451 = vmatpush3.bf16.msra.mxu0 %v1559_v57 }
 0x229   :  { %1452 = vmatprep.subr.bf16.mxu0 %v1723_v43 }
 0x22c   :  { %1453 = vmatpush3.bf16.msra.mxu0 %v1560_v58 }
 0x22d   :  { %1454 = vmatprep.subr.bf16.mxu0 %v1723_v43 }
 0x230   :  { %1455 = vmatpush3.bf16.msra.mxu0 %v1561_v59 }
 0x231   :  { %1456 = vmatprep.subr.bf16.mxu0 %v1723_v43 }
 0x234   :  { %1457 = vmatpush3.bf16.msra.mxu0 %v1562_v60 }
 0x235   :  { %1458 = vmatprep.subr.bf16.mxu0 %v1723_v43 }
 0x238   :  { %1459 = vmatpush3.bf16.msra.mxu0 %v1563_v5 }
 0x239   :  { %1460 = vmatprep.subr.bf16.mxu0 %v1723_v43 }
 0x23c   :  { %1461 = vmatpush3.bf16.msra.mxu0 %v1564_v6 }
 0x2df   :  { %v931_v62 = vpop.f32.mrf.mxu0 }
 0x2e0   :  { %v932_v63 = vadd.f32 %v1249_v61, %v931_v62 }
 0x2e1   :  { %v1424_v0 = vpop.f32.mrf.mxu0 }
 0x2e2   :  { %v937_v1 = vmax.f32 %v932_v63, 0.0 }
 0x2e3   :  { %v934_v2 = vpop.f32.mrf.mxu0 }
 0x2e4   :  { %v938_v3 = vpack.c.bf16 %v937_v1, %v937_v1 }
 0x2e5   :  { %v1425_v4 = vpop.f32.mrf.mxu0 }
 0x2e6   :  { %1443 = vmatmul.mubr.bf16.vlgmr.msra.gmra.mxu1 %v938_v3 }
 0x3a6   :  { %v1044_v8 = vpop.f32.mrf.mxu1 }
 0x3a7   :  { %v1045_v9 = vadd.f32 %v1258_v7, %v1044_v8 }
 0x3a8   :  { %v1444_v10 = vpop.f32.mrf.mxu1 }
 0x3a9   :  { %v1050_v11 = vmax.f32 %v1045_v9, 0.0 }
 0x3aa   :  { %v1047_v12 = vpop.f32.mrf.mxu1 }
 0x3ab   :  { %v1051_v13 = vpack.c.bf16 %v1050_v11, %v1050_v11 }
 0x3ac   :  { %v1445_v14 = vpop.f32.mrf.mxu1 }
 0x3ad   :  { %1463 = vmatmul.mubr.bf16.vlgmr.msra.gmra.mxu0 %v1051_v13 }
 0x46d   :  { %v1157_v43 = vpop.f32.mrf.mxu0 }
 0x46e   :  { %v1158_v16 = vadd.f32 %v1267_v15, %v1157_v43 }
 0x46f   :  { %v1464_v17 = vpop.f32.mrf.mxu0 }
 0x470   :  { %1163 = vst [vmem:[#allocation13] sm:$0xff] %v1158_v16 }
 0x471   :  { %v1160_v18 = vpop.f32.mrf.mxu0 }
 0x472   :  { %1696 = shalt.err (!%p1693_p6)
}
 0x473   :  { %1173 = dma.vmem_to_hbm [thread:$0]  %s1171_s12, 128, %s1891_s11, [#allocation4]   ;;  %v1465_v19 = vpop.f32.mrf.mxu0 }
 0x474   :  { %1713 = dma.done.wait [#allocation4], 128  }
 0x475   :  { %1714 = vsyncadd [#allocation4], 4294967168 }
 0x476   :  { %1177 = vsyncpa [#allocation3], 1 }
 0x477   :  { %1178 = vsyncpa [#allocation6], 1 }
 0x478   :  { %1179 = vsyncpa [#allocation9], 1 }
 0x479   :  { %1180 = vsyncpa [#allocation12], 1 }
 0x47a   :  { %1181 = vsyncpa [#allocation4], 1 }

// kernel: tpu_custom_call.1
= control target key start
LH: loop header
LB: loop body
LE: loop exit
PB: predicated region body
PF: predicated region fallthrough
CT: control target
= control target key end

     0   :  { %16 = vsyncpa [#allocation3], 0  ;;  %s1880_s0 = inlined_call_operand.hbm [shape: bf16[8,784], index: 0, kind: input, shape index: {}]   ;;  %s1881_s1 = inlined_call_operand.hbm [shape: bf16[784,128], index: 1, kind: input, shape index: {}]   ;;  %s1882_s2 = inlined_call_operand.vmem [shape: f32[1,128], index: 2, kind: input, shape index: {}]   ;;  %s1883_s3 = inlined_call_operand.hbm [shape: bf16[128,128], index: 3, kind: input, shape index: {}]   ;;  %s1884_s4 = inlined_call_operand.vmem [shape: f32[1,128], index: 4, kind: input, shape index: {}]   ;;  %s1885_s5 = inlined_call_operand.hbm [shape: bf16[128,128], index: 5, kind: input, shape index: {}]   ;;  %s1886_s6 = inlined_call_operand.vmem [shape: f32[1,128], index: 6, kind: input, shape index: {}]   ;;  %s1887_s7 = inlined_call_operand.hbm [shape: bf16[128,128], index: 7, kind: input, shape index: {}]   ;;  %s1888_s8 = inlined_call_operand.vmem [shape: f32[1,128], index: 8, kind: input, shape index: {}]   ;;  %s1889_s9 = inlined_call_operand.hbm [shape: bf16[128,128], index: 9, kind: input, shape index: {}]   ;;  %s1890_s10 = inlined_call_operand.vmem [shape: f32[1,128], index: 10, kind: input, shape index: {}]   ;;  %s1891_s11 = inlined_call_operand.hbm [shape: f32[8,128], index: 11, kind: output, shape index: {}]  }
   0x1   :  { %17 = vsyncpa [#allocation6], 0 }
   0x2   :  { %18 = vsyncpa [#allocation9], 0 }
   0x3   :  { %19 = vsyncpa [#allocation12], 0 }
   0x4   :  { %20 = vsyncpa [#allocation4], 0  ;;  %s1715_s17 = smov [#allocation5]  }
   0x5   :  { %s36_s18 = sshll.u32 %s1715_s17, 4  ;;  %s37_s18 = int_to_ptr.vmem [resolvable:$true] %s36_s18 }
   0x6   :  { %s1573_s19 = scalar_lea.vmem %s37_s18, 6272  ;;  %p1578_p1 = scmp.lt.s32.totalorder %s37_s18, %s37_s18 }
   0x7   :  { %p1574_p0 = scmp.ne.s32.totalorder %s37_s18, %s1573_s19  ;;  %p1579_p2 = scmp.lt.s32.totalorder %s1573_s19, %s1573_s19 }
   0x9   :  { %p1580_p3 = por %p1579_p2, %p1578_p1 }
   0xb   :  { %p1581_p4 = pnand %p1580_p3, %p1574_p0 }
   0xd   :  { %1584 = shalt.err (!%p1581_p4)
}
   0xe   :  { %s1716_s20 = smov 64   ;;  %s1717_s21 = smov 4  }
   0xf   :  { %42 = dma.hbm_to_vmem [thread:$0]  %s1881_s1, 6272, %s37_s18, [#allocation6], %s1716_s20, %s1716_s20, %s1717_s21  }
  0x10   :  { %s1718_s24 = smov [#allocation8]   ;;  %s1719_s26 = smov [#allocation2]  }
  0x11   :  { %s64_s25 = sshll.u32 %s1718_s24, 4  ;;  %s27_s27 = sshll.u32 %s1719_s26, 4  ;;  %s65_s25 = int_to_ptr.vmem [resolvable:$true] %s64_s25  ;;  %s28_s27 = int_to_ptr.vmem [resolvable:$true] %s27_s27 }
  0x12   :  { %s1593_s28 = scalar_lea.vmem %s65_s25, 1024  ;;  %p1598_p6 = scmp.lt.s32.totalorder %s65_s25, %s65_s25 }
  0x13   :  { %p1594_p5 = scmp.ne.s32.totalorder %s65_s25, %s1593_s28  ;;  %p1599_p7 = scmp.lt.s32.totalorder %s1593_s28, %s1593_s28 }
  0x15   :  { %p1600_p8 = por %p1599_p7, %p1598_p6 }
  0x17   :  { %p1601_p9 = pnand %p1600_p8, %p1594_p5 }
  0x19   :  { %1604 = shalt.err (!%p1601_p9)
}
  0x1a   :  { %70 = dma.hbm_to_vmem [thread:$0]  %s1885_s5, 1024, %s65_s25, [#allocation9], %s1716_s20, %s1716_s20, %s1717_s21  }
  0x1b   :  { %s1613_s1 = scalar_lea.vmem %s28_s27, 448  ;;  %p1618_p11 = scmp.lt.s32.totalorder %s28_s27, %s28_s27 }
  0x1c   :  { %p1614_p10 = scmp.ne.s32.totalorder %s28_s27, %s1613_s1  ;;  %p1619_p12 = scmp.lt.s32.totalorder %s1613_s1, %s1613_s1 }
  0x1e   :  { %p1620_p13 = por %p1619_p12, %p1618_p11 }
  0x20   :  { %p1621_p0 = pnand %p1620_p13, %p1614_p10 }
  0x22   :  { %1624 = shalt.err (!%p1621_p0)
}
  0x23   :  { %30 = dma.hbm_to_vmem [thread:$0]  %s1880_s0, 448, %s28_s27, [#allocation3]  }
  0x24   :  { %s1720_s14 = smov [#allocation7]   ;;  %s1721_s16 = smov [#allocation10]  }
  0x25   :  { %s50_s15 = sshll.u32 %s1720_s14, 4  ;;  %s78_s17 = sshll.u32 %s1721_s16, 4  ;;  %s51_s15 = int_to_ptr.vmem [resolvable:$true] %s50_s15  ;;  %s79_s17 = int_to_ptr.vmem [resolvable:$true] %s78_s17 }
  0x26   :  { %s1633_s18 = scalar_lea.vmem %s51_s15, 1024  ;;  %p1638_p2 = scmp.lt.s32.totalorder %s51_s15, %s51_s15 }
  0x27   :  { %p1634_p1 = scmp.ne.s32.totalorder %s51_s15, %s1633_s18  ;;  %p1639_p3 = scmp.lt.s32.totalorder %s1633_s18, %s1633_s18 }
  0x29   :  { %p1640_p4 = por %p1639_p3, %p1638_p2 }
  0x2b   :  { %p1641_p5 = pnand %p1640_p4, %p1634_p1 }
  0x2d   :  { %1644 = shalt.err (!%p1641_p5)
}
  0x2e   :  { %56 = dma.hbm_to_vmem [thread:$0]  %s1883_s3, 1024, %s51_s15, [#allocation6], %s1716_s20, %s1716_s20, %s1717_s21  }
  0x2f   :  { %s1653_s0 = scalar_lea.vmem %s79_s17, 1024  ;;  %p1658_p7 = scmp.lt.s32.totalorder %s79_s17, %s79_s17 }
  0x30   :  { %p1654_p6 = scmp.ne.s32.totalorder %s79_s17, %s1653_s0  ;;  %p1659_p8 = scmp.lt.s32.totalorder %s1653_s0, %s1653_s0 }
  0x32   :  { %p1660_p9 = por %p1659_p8, %p1658_p7 }
  0x34   :  { %p1661_p10 = pnand %p1660_p9, %p1654_p6 }
  0x36   :  { %1664 = shalt.err (!%p1661_p10)
}
  0x37   :  { %84 = dma.hbm_to_vmem [thread:$0]  %s1887_s7, 1024, %s79_s17, [#allocation9], %s1716_s20, %s1716_s20, %s1717_s21  }
  0x38   :  { %s1722_s24 = smov [#allocation11]  }
  0x39   :  { %s92_s25 = sshll.u32 %s1722_s24, 4  ;;  %s93_s25 = int_to_ptr.vmem [resolvable:$true] %s92_s25 }
  0x3a   :  { %s1673_s26 = scalar_lea.vmem %s93_s25, 1024  ;;  %p1678_p12 = scmp.lt.s32.totalorder %s93_s25, %s93_s25 }
  0x3b   :  { %p1674_p11 = scmp.ne.s32.totalorder %s93_s25, %s1673_s26  ;;  %p1679_p13 = scmp.lt.s32.totalorder %s1673_s26, %s1673_s26 }
  0x3d   :  { %p1680_p0 = por %p1679_p13, %p1678_p12 }
  0x3f   :  { %p1681_p1 = pnand %p1680_p0, %p1674_p11 }
  0x41   :  { %1684 = shalt.err (!%p1681_p1)
}
  0x42   :  { %98 = dma.hbm_to_vmem [thread:$0]  %s1889_s9, 1024, %s93_s25, [#allocation12], %s1716_s20, %s1716_s20, %s1717_s21  }
  0x43   :  { %1705 = dma.done.wait [#allocation3], 448  }
  0x44   :  { %1706 = vsyncadd [#allocation3], 4294966848 }
  0x45   :  { %1707 = dma.done.wait [#allocation6], 7296  }
  0x46   :  { %1708 = vsyncadd [#allocation6], 4294960000 }
  0x47   :  { %1709 = dma.done.wait [#allocation9], 2048  }
  0x48   :  { %1710 = vsyncadd [#allocation9], 4294965248 }
  0x49   :  { %1711 = dma.done.wait [#allocation12], 1024  }
  0x4a   :  { %1712 = vsyncadd [#allocation12], 4294966272  ;;  %v1477_v0 = vld [vmem:[#allocation5 + $0x78] sm:$0xff]   ;;  %v1481_v4 = vld [vmem:[#allocation5 + $0x70] sm:$0xff]   ;;  %v1723_v43 = vmov 0.0   ;;  %vm1724_vm0 = vmmov 0  }
  0x4b   :  { %v1478_v1 = vld [vmem:[#allocation5 + $0x38] sm:$0xff]   ;;  %1276 = vmatprep.subr.bf16.mxu0 %v1477_v0  ;;  %v1482_v5 = vld [vmem:[#allocation5 + $0x30] sm:$0xff]   ;;  %v1485_v8 = vld [vmem:[#allocation5 + $0x68] sm:$0xff]   ;;  %vm547_vm1 = vcmask 130048   ;;  %s1725_s1 = smov [#allocation13]  }
  0x4c   :  { %v1479_v2 = vld [vmem:[#allocation5 + $0xf8] sm:$0xff]   ;;  %1277 = vmatpush3.bf16.msra.mxu0 %v1478_v1  ;;  %v1483_v6 = vld [vmem:[#allocation5 + $0xf0] sm:$0xff]   ;;  %v1486_v9 = vld [vmem:[#allocation5 + $0x28] sm:$0xff]   ;;  %s1170_s12 = sshll.u32 %s1725_s1, 4  ;;  %s1171_s12 = int_to_ptr.vmem [resolvable:$true] %s1170_s12 }
  0x4d   :  { %v1480_v3 = vld [vmem:[#allocation5 + $0xb8] sm:$0xff]   ;;  %1298 = vmatprep.subr.bf16.mxu1 %v1479_v2  ;;  %1278 = vmatprep.subr.bf16.mxu0 %v1481_v4  ;;  %v1484_v7 = vld [vmem:[#allocation5 + $0xb0] sm:$0xff]   ;;  %v1487_v10 = vld [vmem:[#allocation5 + $0xe8] sm:$0xff]   ;;  %p1690_p3 = scmp.lt.s32.totalorder %s1171_s12, %s1171_s12 }
  0x4e   :  { %1299 = vmatpush3.bf16.msra.mxu1 %v1480_v3  ;;  %v1488_v11 = vld [vmem:[#allocation5 + $0xa8] sm:$0xff]   ;;  %v1489_v12 = vld [vmem:[#allocation5 + $0x60] sm:$0xff]   ;;  %v1493_v16 = vld [vmem:[#allocation5 + $0x58] sm:$0xff]  }
  0x4f   :  { %1300 = vmatprep.subr.bf16.mxu1 %v1483_v6  ;;  %v1490_v13 = vld [vmem:[#allocation5 + $0x20] sm:$0xff]   ;;  %v1494_v17 = vld [vmem:[#allocation5 + $0x18] sm:$0xff]   ;;  %v1497_v20 = vld [vmem:[#allocation5 + $0x50] sm:$0xff]  }
  0x50   :  { %1279 = vmatpush3.bf16.msra.mxu0 %v1482_v5  ;;  %v1491_v14 = vld [vmem:[#allocation5 + $0xe0] sm:$0xff]   ;;  %v1495_v18 = vld [vmem:[#allocation5 + $0xd8] sm:$0xff]   ;;  %v1498_v21 = vld [vmem:[#allocation5 + $0x10] sm:$0xff]  }
  0x51   :  { %1280 = vmatprep.subr.bf16.mxu0 %v1485_v8  ;;  %v1492_v15 = vld [vmem:[#allocation5 + $0xa0] sm:$0xff]   ;;  %v1496_v19 = vld [vmem:[#allocation5 + $0x98] sm:$0xff]   ;;  %v1499_v22 = vld [vmem:[#allocation5 + $0xd0] sm:$0xff]  }
  0x52   :  { %1301 = vmatpush3.bf16.msra.mxu1 %v1484_v7  ;;  %v1500_v23 = vld [vmem:[#allocation5 + $0x90] sm:$0xff]   ;;  %v1501_v24 = vld [vmem:[#allocation5 + $0x48] sm:$0xff]   ;;  %v1505_v28 = vld [vmem:[#allocation5 + $0x40] sm:$0xff]  }
  0x53   :  { %1302 = vmatprep.subr.bf16.mxu1 %v1487_v10  ;;  %v1502_v25 = vld [vmem:[#allocation5 + $0x8] sm:$0xff]   ;;  %v1506_v29 = vld [vmem:[#allocation5] sm:$0xff]   ;;  %v1511_v35 = vld [vmem:[#allocation5 + $0x178] sm:$0xff]  }
  0x54   :  { %1281 = vmatpush3.bf16.msra.mxu0 %v1486_v9  ;;  %v1503_v26 = vld [vmem:[#allocation5 + $0xc8] sm:$0xff]   ;;  %v1507_v30 = vld [vmem:[#allocation5 + $0xc0] sm:$0xff]   ;;  %v1514_v39 = vld [vmem:[#allocation5 + $0x138] sm:$0xff]  }
  0x55   :  { %1282 = vmatprep.subr.bf16.mxu0 %v1489_v12  ;;  %v1504_v27 = vld [vmem:[#allocation5 + $0x88] sm:$0xff]   ;;  %v1510_v34 = vld [vmem:[#allocation5 + $0x80] sm:$0xff]   ;;  %v1515_v40 = vld [vmem:[#allocation5 + $0x170] sm:$0xff]  }
  0x56   :  { %1303 = vmatpush3.bf16.msra.mxu1 %v1488_v11  ;;  %v120_v31 = vld [vmem:[#allocation2] sm:$0xff]  ;;  %v121_v36 = vld [vmem:[#allocation2 + $0x8] sm:$0xff]  ;;  %v1521_v47 = vld [vmem:[#allocation5 + $0x158] sm:$0xff]  }
  0x57   :  { %1304 = vmatprep.subr.bf16.mxu1 %v1491_v14  ;;  %v1183_v32 = vcombine.low %v120_v31, %v120_v31  ;;  %v1184_v33 = vcombine.high %v120_v31, %v120_v31  ;;  %v1185_v37 = vcombine.low %v121_v36, %v121_v36  ;;  %v1186_v38 = vcombine.high %v121_v36, %v121_v36  ;;  %v1516_v41 = vld [vmem:[#allocation5 + $0x130] sm:$0xff]   ;;  %v1517_v42 = vld [vmem:[#allocation5 + $0x168] sm:$0xff]   ;;  %v1519_v45 = vld [vmem:[#allocation5 + $0x160] sm:$0xff]  }
  0x58   :  { %1283 = vmatpush3.bf16.msra.mxu0 %v1490_v13  ;;  %v1518_v44 = vld [vmem:[#allocation5 + $0x128] sm:$0xff]   ;;  %v1520_v46 = vld [vmem:[#allocation5 + $0x120] sm:$0xff]   ;;  %v1522_v48 = vld [vmem:[#allocation5 + $0x118] sm:$0xff]  }
  0x59   :  { %1284 = vmatprep.subr.bf16.mxu0 %v1493_v16  ;;  %583 = vmatprep.mubr.bf16.mxu0 %v1184_v33  ;;  %v1523_v49 = vld [vmem:[#allocation5 + $0x150] sm:$0xff]   ;;  %v1529_v50 = vld [vmem:[#allocation5 + $0x180] sm:$0xff]   ;;  %v1532_v54 = vld [vmem:[#allocation2 + $0x18] ss:$0 sps:$4 sm:$0xff]  }
  0x5a   :  { %1305 = vmatpush3.bf16.msra.mxu1 %v1492_v15  ;;  %623 = vmatprep.mubr.bf16.mxu1 %v1186_v38  ;;  %v122_v51 = vld [vmem:[#allocation2 + $0x10] sm:$0xff]  ;;  %v1525_v55 = vld [vmem:[#allocation5 + $0x148] sm:$0xff]   ;;  %v1527_v57 = vld [vmem:[#allocation5 + $0x140] sm:$0xff]  }
  0x5b   :  { %1306 = vmatprep.subr.bf16.mxu1 %v1495_v18  ;;  %v1524_v52 = vld [vmem:[#allocation5 + $0x110] sm:$0xff]   ;;  %v1188_v53 = vcombine.high %v122_v51, %v122_v51  ;;  %v1526_v56 = vld [vmem:[#allocation5 + $0x108] sm:$0xff]   ;;  %v1528_v58 = vld [vmem:[#allocation5 + $0x100] sm:$0xff]   ;;  %v1187_v59 = vcombine.low %v122_v51, %v122_v51 }
  0x5c   :  { %1285 = vmatpush3.bf16.msra.mxu0 %v1494_v17  ;;  %v1533_v60 = vld [vmem:[#allocation7 + $0x38] sm:$0xff]   ;;  %v1534_v61 = vld [vmem:[#allocation7 + $0x30] sm:$0xff]   ;;  %v1535_v62 = vld [vmem:[#allocation7 + $0x28] sm:$0xff]  }
  0x5d   :  { %1286 = vmatprep.subr.bf16.mxu0 %v1497_v20  ;;  %v1536_v63 = vld [vmem:[#allocation7 + $0x20] sm:$0xff]   ;;  %v1537_v0 = vld [vmem:[#allocation7 + $0x18] sm:$0xff]   ;;  %v1538_v1 = vld [vmem:[#allocation7 + $0x10] sm:$0xff]  }
  0x5e   :  { %1307 = vmatpush3.bf16.msra.mxu1 %v1496_v19  ;;  %v1539_v2 = vld [vmem:[#allocation7 + $0x8] sm:$0xff]   ;;  %v1540_v3 = vld [vmem:[#allocation7] sm:$0xff]   ;;  %v1541_v4 = vld [vmem:[#allocation8 + $0x38] sm:$0xff]  }
  0x5f   :  { %1308 = vmatprep.subr.bf16.mxu1 %v1499_v22  ;;  %v1542_v5 = vld [vmem:[#allocation8 + $0x30] sm:$0xff]   ;;  %v1543_v6 = vld [vmem:[#allocation8 + $0x28] sm:$0xff]   ;;  %v1544_v7 = vld [vmem:[#allocation8 + $0x20] sm:$0xff]  }
  0x60   :  { %1287 = vmatpush3.bf16.msra.mxu0 %v1498_v21  ;;  %v1545_v8 = vld [vmem:[#allocation8 + $0x18] sm:$0xff]   ;;  %v1546_v9 = vld [vmem:[#allocation8 + $0x10] sm:$0xff]   ;;  %v1547_v36 = vld [vmem:[#allocation8 + $0x8] sm:$0xff]  }
  0x61   :  { %1288 = vmatprep.subr.bf16.mxu0 %v1501_v24  ;;  %v1549_v38 = vld [vmem:[#allocation10 + $0x38] sm:$0xff]  }
  0x62   :  { %1309 = vmatpush3.bf16.msra.mxu1 %v1500_v23  ;;  %v1182_v23 = vld [vmem:[%s1882_s2] ss:$0 sm:$0xff] }
  0x63   :  { %1310 = vmatprep.subr.bf16.mxu1 %v1503_v26 }
  0x64   :  { %1289 = vmatpush3.bf16.msra.mxu0 %v1502_v25 }
  0x65   :  { %1290 = vmatprep.subr.bf16.mxu0 %v1505_v28 }
  0x66   :  { %1311 = vmatpush3.bf16.msra.mxu1 %v1504_v27 }
  0x67   :  { %1312 = vmatprep.subr.bf16.mxu1 %v1507_v30 }
  0x68   :  { %1291 = vmatpush3.bf16.msra.mxu0 %v1506_v29 }
  0x69   :  { %1320 = vmatprep.subr.bf16.mxu0 %v1511_v35 }
  0x6a   :  { %1313 = vmatpush3.bf16.msra.mxu1 %v1510_v34 }
  0x6b   :  { %584 = vmatmul.mubr.bf16.vlgmr.msra.gmra.mxu0 %v1183_v32  ;;  %1380 = vmatprep.subr.bf16.mxu1 %v1723_v43 }
  0x6c   :  { %1321 = vmatpush3.bf16.msra.mxu0 %v1514_v39  ;;  %663 = vmatprep.mubr.bf16.mxu0 %v1188_v53  ;;  %v1550_v39 = vld [vmem:[#allocation10 + $0x30] sm:$0xff]   ;;  %v1555_v53 = vld [vmem:[#allocation10 + $0x8] sm:$0xff]  }
  0x6d   :  { %624 = vmatmul.mubr.bf16.vlgmr.msra.gmra.mxu1 %v1185_v37  ;;  %1322 = vmatprep.subr.bf16.mxu0 %v1515_v40  ;;  %v1548_v37 = vld [vmem:[#allocation8] sm:$0xff]   ;;  %v1551_v40 = vld [vmem:[#allocation10 + $0x28] sm:$0xff]  }
  0x6e   :  { %1382 = vmatprep.mubr.msk.bf16.mxu1 %vm1724_vm0, %v1723_v43  ;;  %1381 = vmatpush3.bf16.msra.mxu1 %v1529_v50 }
  0x6f   :  { %1386 = vmatprep.subr.bf16.mxu1 %v1723_v43 }
  0x70   :  { %1323 = vmatpush3.bf16.msra.mxu0 %v1516_v41  ;;  %v1552_v41 = vld [vmem:[#allocation10 + $0x20] sm:$0xff]  }
  0x71   :  { %1324 = vmatprep.subr.bf16.mxu0 %v1517_v42  ;;  %v1553_v42 = vld [vmem:[#allocation10 + $0x18] sm:$0xff]  }
  0x74   :  { %1325 = vmatpush3.bf16.msra.mxu0 %v1518_v44  ;;  %v1554_v44 = vld [vmem:[#allocation10 + $0x10] sm:$0xff]  }
  0x75   :  { %1326 = vmatprep.subr.bf16.mxu0 %v1519_v45  ;;  %1383 = vmatmul.mubr.msk.bf16.vlgmr.msra.gmra.mxu1 %vm547_vm1, %v1532_v54  ;;  %v1240_v45 = vld [vmem:[%s1884_s4] ss:$0 sm:$0xff]  ;;  %v1556_v54 = vld [vmem:[#allocation10] sm:$0xff]  }
  0x76   :  { %1402 = vmatprep.mubr.msk.bf16.mxu1 %vm1724_vm0, %v1723_v43  ;;  %1387 = vmatpush3.bf16.msra.mxu1 %v1533_v60  ;;  %v1562_v60 = vld [vmem:[#allocation11 + $0x10] sm:$0xff]  }
  0x77   :  { %1388 = vmatprep.subr.bf16.mxu1 %v1723_v43 }
  0x78   :  { %1327 = vmatpush3.bf16.msra.mxu0 %v1520_v46 }
  0x79   :  { %1328 = vmatprep.subr.bf16.mxu0 %v1521_v47 }
  0x7a   :  { %1389 = vmatpush3.bf16.msra.mxu1 %v1534_v61  ;;  %v1249_v61 = vld [vmem:[%s1886_s6] ss:$0 sm:$0xff] }
  0x7b   :  { %1390 = vmatprep.subr.bf16.mxu1 %v1723_v43 }
  0x7c   :  { %1329 = vmatpush3.bf16.msra.mxu0 %v1522_v48 }
  0x7d   :  { %1330 = vmatprep.subr.bf16.mxu0 %v1523_v49 }
  0x7e   :  { %1391 = vmatpush3.bf16.msra.mxu1 %v1535_v62 }
  0x7f   :  { %1392 = vmatprep.subr.bf16.mxu1 %v1723_v43 }
  0x80   :  { %1331 = vmatpush3.bf16.msra.mxu0 %v1524_v52 }
  0x81   :  { %1332 = vmatprep.subr.bf16.mxu0 %v1525_v55  ;;  %v1557_v55 = vld [vmem:[#allocation11 + $0x38] sm:$0xff]  }
  0x82   :  { %1393 = vmatpush3.bf16.msra.mxu1 %v1536_v63 }
  0x83   :  { %1394 = vmatprep.subr.bf16.mxu1 %v1723_v43 }
  0x84   :  { %1333 = vmatpush3.bf16.msra.mxu0 %v1526_v56  ;;  %v1558_v56 = vld [vmem:[#allocation11 + $0x30] sm:$0xff]  }
  0x85   :  { %1334 = vmatprep.subr.bf16.mxu0 %v1527_v57  ;;  %v1559_v57 = vld [vmem:[#allocation11 + $0x28] sm:$0xff]  }
  0x86   :  { %1395 = vmatpush3.bf16.msra.mxu1 %v1537_v0 }
  0x87   :  { %1396 = vmatprep.subr.bf16.mxu1 %v1723_v43 }
  0x88   :  { %1335 = vmatpush3.bf16.msra.mxu0 %v1528_v58  ;;  %v1560_v58 = vld [vmem:[#allocation11 + $0x20] sm:$0xff]  }
  0x89   :  { %1406 = vmatprep.subr.bf16.mxu0 %v1723_v43 }
  0x8a   :  { %1397 = vmatpush3.bf16.msra.mxu1 %v1538_v1 }
  0x8b   :  { %664 = vmatmul.mubr.bf16.vlgmr.msra.gmra.mxu0 %v1187_v59  ;;  %1398 = vmatprep.subr.bf16.mxu1 %v1723_v43  ;;  %v1561_v59 = vld [vmem:[#allocation11 + $0x18] sm:$0xff]  }
  0x8c   :  { %1422 = vmatprep.mubr.msk.bf16.mxu0 %vm1724_vm0, %v1723_v43  ;;  %1407 = vmatpush3.bf16.msra.mxu0 %v1541_v4 }
  0x8d   :  { %1408 = vmatprep.subr.bf16.mxu0 %v1723_v43 }
  0x8e   :  { %1399 = vmatpush3.bf16.msra.mxu1 %v1539_v2 }
  0x8f   :  { %1400 = vmatprep.subr.bf16.mxu1 %v1723_v43 }
  0x90   :  { %1409 = vmatpush3.bf16.msra.mxu0 %v1542_v5  ;;  %v1563_v5 = vld [vmem:[#allocation11 + $0x8] sm:$0xff]  }
  0x91   :  { %1410 = vmatprep.subr.bf16.mxu0 %v1723_v43 }
  0x92   :  { %1401 = vmatpush3.bf16.msra.mxu1 %v1540_v3 }
  0x93   :  { %1426 = vmatprep.subr.bf16.mxu1 %v1723_v43 }
  0x94   :  { %1411 = vmatpush3.bf16.msra.mxu0 %v1543_v6  ;;  %v1564_v6 = vld [vmem:[#allocation11] sm:$0xff]  }
  0x95   :  { %1412 = vmatprep.subr.bf16.mxu0 %v1723_v43 }
  0x98   :  { %1413 = vmatpush3.bf16.msra.mxu0 %v1544_v7  ;;  %v1258_v7 = vld [vmem:[%s1888_s8] ss:$0 sm:$0xff]  ;;  %s1685_s8 = scalar_lea.vmem %s1171_s12, 128 }
  0x99   :  { %1414 = vmatprep.subr.bf16.mxu0 %v1723_v43  ;;  %p1686_p2 = scmp.ne.s32.totalorder %s1171_s12, %s1685_s8  ;;  %p1691_p4 = scmp.lt.s32.totalorder %s1685_s8, %s1685_s8 }
  0x9b   :  { %p1692_p5 = por %p1691_p4, %p1690_p3 }
  0x9c   :  { %1415 = vmatpush3.bf16.msra.mxu0 %v1545_v8 }
  0x9d   :  { %1416 = vmatprep.subr.bf16.mxu0 %v1723_v43  ;;  %p1693_p6 = pnand %p1692_p5, %p1686_p2 }
  0xa0   :  { %1417 = vmatpush3.bf16.msra.mxu0 %v1546_v9 }
  0xa1   :  { %1418 = vmatprep.subr.bf16.mxu0 %v1723_v43 }
  0xa4   :  { %1419 = vmatpush3.bf16.msra.mxu0 %v1547_v36 }
  0xa5   :  { %1420 = vmatprep.subr.bf16.mxu0 %v1723_v43 }
  0xa8   :  { %1421 = vmatpush3.bf16.msra.mxu0 %v1548_v37 }
  0xa9   :  { %1446 = vmatprep.subr.bf16.mxu0 %v1723_v43 }
 0x12b   :  { %v1292_v10 = vpop.f32.mrf.mxu0 }
 0x12d   :  { %v1293_v11 = vpop.f32.mrf.mxu0  ;;  %v1314_v12 = vpop.f32.mrf.mxu1 }
 0x12e   :  { %v1294_v22 = vadd.f32 %v1293_v11, %v1292_v10 }
 0x12f   :  { %v1295_v13 = vpop.f32.mrf.mxu0  ;;  %v1315_v14 = vpop.f32.mrf.mxu1 }
 0x130   :  { %v586_v24 = vadd.f32 %v1294_v22, %v1182_v23  ;;  %v1316_v25 = vadd.f32 %v1315_v14, %v1314_v12 }
 0x131   :  { %v1296_v15 = vpop.f32.mrf.mxu0  ;;  %v1317_v16 = vpop.f32.mrf.mxu1 }
 0x132   :  { %v626_v28 = vadd.f32 %v1316_v25, %v586_v24  ;;  %v1267_v15 = vld [vmem:[%s1890_s10] ss:$0 sm:$0xff] }
 0x133   :  { %v1318_v17 = vpop.f32.mrf.mxu1 }
 0x135   :  { %v705_v18 = vpop.f32.mrf.mxu1 }
 0x137   :  { %v1384_v19 = vpop.f32.mrf.mxu1 }
 0x139   :  { %v708_v20 = vpop.f32.mrf.mxu1 }
 0x13b   :  { %v1385_v21 = vpop.f32.mrf.mxu1 }
 0x14b   :  { %v1336_v26 = vpop.f32.mrf.mxu0 }
 0x14d   :  { %v1337_v27 = vpop.f32.mrf.mxu0 }
 0x14e   :  { %v1338_v29 = vadd.f32 %v1337_v27, %v1336_v26 }
 0x14f   :  { %v1339_v30 = vpop.f32.mrf.mxu0 }
 0x150   :  { %v666_v31 = vadd.f32 %v1338_v29, %v626_v28 }
 0x151   :  { %v1340_v32 = vpop.f32.mrf.mxu0 }
 0x152   :  { %v706_v33 = vadd.f32 %v705_v18, %v666_v31 }
 0x154   :  { %v711_v34 = vmax.f32 %v706_v33, 0.0 }
 0x156   :  { %v712_v35 = vpack.c.bf16 %v711_v34, %v711_v34 }
 0x158   :  { %1403 = vmatmul.mubr.bf16.vlgmr.msra.gmra.mxu1 %v712_v35 }
 0x159   :  { %1442 = vmatprep.mubr.msk.bf16.mxu1 %vm1724_vm0, %v1723_v43  ;;  %1427 = vmatpush3.bf16.msra.mxu1 %v1549_v38 }
 0x15a   :  { %1428 = vmatprep.subr.bf16.mxu1 %v1723_v43 }
 0x15d   :  { %1429 = vmatpush3.bf16.msra.mxu1 %v1550_v39 }
 0x15e   :  { %1430 = vmatprep.subr.bf16.mxu1 %v1723_v43 }
 0x161   :  { %1431 = vmatpush3.bf16.msra.mxu1 %v1551_v40 }
 0x162   :  { %1432 = vmatprep.subr.bf16.mxu1 %v1723_v43 }
 0x165   :  { %1433 = vmatpush3.bf16.msra.mxu1 %v1552_v41 }
 0x166   :  { %1434 = vmatprep.subr.bf16.mxu1 %v1723_v43 }
 0x169   :  { %1435 = vmatpush3.bf16.msra.mxu1 %v1553_v42 }
 0x16a   :  { %1436 = vmatprep.subr.bf16.mxu1 %v1723_v43 }
 0x16d   :  { %1437 = vmatpush3.bf16.msra.mxu1 %v1554_v44 }
 0x16e   :  { %1438 = vmatprep.subr.bf16.mxu1 %v1723_v43 }
 0x171   :  { %1439 = vmatpush3.bf16.msra.mxu1 %v1555_v53 }
 0x172   :  { %1440 = vmatprep.subr.bf16.mxu1 %v1723_v43 }
 0x175   :  { %1441 = vmatpush3.bf16.msra.mxu1 %v1556_v54 }
 0x218   :  { %v818_v46 = vpop.f32.mrf.mxu1 }
 0x219   :  { %v819_v47 = vadd.f32 %v1240_v45, %v818_v46 }
 0x21a   :  { %v1404_v48 = vpop.f32.mrf.mxu1 }
 0x21b   :  { %v824_v49 = vmax.f32 %v819_v47, 0.0 }
 0x21c   :  { %v821_v50 = vpop.f32.mrf.mxu1 }
 0x21d   :  { %v825_v51 = vpack.c.bf16 %v824_v49, %v824_v49 }
 0x21e   :  { %v1405_v52 = vpop.f32.mrf.mxu1 }
 0x21f   :  { %1423 = vmatmul.mubr.bf16.vlgmr.msra.gmra.mxu0 %v825_v51 }
 0x220   :  { %1462 = vmatprep.mubr.msk.bf16.mxu0 %vm1724_vm0, %v1723_v43  ;;  %1447 = vmatpush3.bf16.msra.mxu0 %v1557_v55 }
 0x221   :  { %1448 = vmatprep.subr.bf16.mxu0 %v1723_v43 }
 0x224   :  { %1449 = vmatpush3.bf16.msra.mxu0 %v1558_v56 }
 0x225   :  { %1450 = vmatprep.subr.bf16.mxu0 %v1723_v43 }
 0x228   :  { %1451 = vmatpush3.bf16.msra.mxu0 %v1559_v57 }
 0x229   :  { %1452 = vmatprep.subr.bf16.mxu0 %v1723_v43 }
 0x22c   :  { %1453 = vmatpush3.bf16.msra.mxu0 %v1560_v58 }
 0x22d   :  { %1454 = vmatprep.subr.bf16.mxu0 %v1723_v43 }
 0x230   :  { %1455 = vmatpush3.bf16.msra.mxu0 %v1561_v59 }
 0x231   :  { %1456 = vmatprep.subr.bf16.mxu0 %v1723_v43 }
 0x234   :  { %1457 = vmatpush3.bf16.msra.mxu0 %v1562_v60 }
 0x235   :  { %1458 = vmatprep.subr.bf16.mxu0 %v1723_v43 }
 0x238   :  { %1459 = vmatpush3.bf16.msra.mxu0 %v1563_v5 }
 0x239   :  { %1460 = vmatprep.subr.bf16.mxu0 %v1723_v43 }
 0x23c   :  { %1461 = vmatpush3.bf16.msra.mxu0 %v1564_v6 }
 0x2df   :  { %v931_v62 = vpop.f32.mrf.mxu0 }
 0x2e0   :  { %v932_v63 = vadd.f32 %v1249_v61, %v931_v62 }
 0x2e1   :  { %v1424_v0 = vpop.f32.mrf.mxu0 }
 0x2e2   :  { %v937_v1 = vmax.f32 %v932_v63, 0.0 }
 0x2e3   :  { %v934_v2 = vpop.f32.mrf.mxu0 }
 0x2e4   :  { %v938_v3 = vpack.c.bf16 %v937_v1, %v937_v1 }
 0x2e5   :  { %v1425_v4 = vpop.f32.mrf.mxu0 }
 0x2e6   :  { %1443 = vmatmul.mubr.bf16.vlgmr.msra.gmra.mxu1 %v938_v3 }
 0x3a6   :  { %v1044_v8 = vpop.f32.mrf.mxu1 }
 0x3a7   :  { %v1045_v9 = vadd.f32 %v1258_v7, %v1044_v8 }
 0x3a8   :  { %v1444_v10 = vpop.f32.mrf.mxu1 }
 0x3a9   :  { %v1050_v11 = vmax.f32 %v1045_v9, 0.0 }
 0x3aa   :  { %v1047_v12 = vpop.f32.mrf.mxu1 }
 0x3ab   :  { %v1051_v13 = vpack.c.bf16 %v1050_v11, %v1050_v11 }
 0x3ac   :  { %v1445_v14 = vpop.f32.mrf.mxu1 }
 0x3ad   :  { %1463 = vmatmul.mubr.bf16.vlgmr.msra.gmra.mxu0 %v1051_v13 }
 0x46d   :  { %v1157_v43 = vpop.f32.mrf.mxu0 }
 0x46e   :  { %v1158_v16 = vadd.f32 %v1267_v15, %v1157_v43 }
 0x46f   :  { %v1464_v17 = vpop.f32.mrf.mxu0 }
 0x470   :  { %1163 = vst [vmem:[#allocation13] sm:$0xff] %v1158_v16 }
 0x471   :  { %v1160_v18 = vpop.f32.mrf.mxu0 }
 0x472   :  { %1696 = shalt.err (!%p1693_p6)
}
 0x473   :  { %1173 = dma.vmem_to_hbm [thread:$0]  %s1171_s12, 128, %s1891_s11, [#allocation4]   ;;  %v1465_v19 = vpop.f32.mrf.mxu0 }
 0x474   :  { %1713 = dma.done.wait [#allocation4], 128  }
 0x475   :  { %1714 = vsyncadd [#allocation4], 4294967168 }
 0x476   :  { %1177 = vsyncpa [#allocation3], 1 }
 0x477   :  { %1178 = vsyncpa [#allocation6], 1 }
 0x478   :  { %1179 = vsyncpa [#allocation9], 1 }
 0x479   :  { %1180 = vsyncpa [#allocation12], 1 }
 0x47a   :  { %1181 = vsyncpa [#allocation4], 1 }

</bundles_post_ra>
